<compile_context>
chip_gen: v7x
topology: tpu7x:2x2x1
jax: 0.10.0
libtpu: 0.0.40
codegen_flags: <defaults>
</compile_context>

<pallas_src>
import functools

import jax
import jax.numpy as jnp
import numpy as np
from jax.experimental import pallas as pl
from jax.experimental.pallas import tpu as pltpu


def _round_up(x, m):
    return ((x + m - 1) // m) * m


# ----------------------------------------------------------------------------
# Fused kernel. One grid step = (batch block b, time tile t):
#   p   = relu(x @ W1 + b1) @ W2          (bf16 MXU inputs, f32 accumulate)
#   p  *= (0 <= global_t < seq_len)
#   mem = p + sum_{j=-lctx..rctx} f_mat[j+lctx, :] * p[t+j, :]
# Halo rows of p (outside the tile) are recomputed from small x halo blocks.
# ----------------------------------------------------------------------------
def _cfsmn_kernel(seq_ref, xc_ref, xl_ref, xr_ref, w1_ref, b1_ref, w2_ref,
                  f_ref, mem_ref, pbuf_ref, *, lctx, rctx, Bp, Tt, HB, T_total):
    b = pl.program_id(0)
    t = pl.program_id(1)
    D = xc_ref.shape[-1]
    t0 = t * Tt                                    # global start frame of tile

    def project(x3):
        # (Bp, R, D) bf16 -> (Bp, R, M) f32 : relu(x @ W1 + b1) @ W2
        R = x3.shape[1]
        x2 = x3.reshape(Bp * R, D)
        h = jnp.dot(x2, w1_ref[...], preferred_element_type=jnp.float32)
        h = jnp.maximum(h + b1_ref[...], 0.0)      # upper_bound=None, dropout eval
        p = jnp.dot(h.astype(jnp.bfloat16), w2_ref[...],
                    preferred_element_type=jnp.float32)
        return p.reshape(Bp, R, x3.shape[1] and w2_ref.shape[1])

    def seq_mask(g):
        # g: (Bp, R, 1) global frame indices -> bool validity (per sub-batch len)
        b_idx = jax.lax.broadcasted_iota(jnp.int32, g.shape, 0)
        lens = jnp.zeros(g.shape, jnp.int32) + seq_ref[b * Bp]
        for i in range(1, Bp):
            lens = jnp.where(b_idx == i, seq_ref[b * Bp + i], lens)
        lens = jnp.minimum(lens, T_total)
        return (g >= 0) & (g < lens)

    def masked_project(x_ref_, start):
        R = x_ref_.shape[1]
        p = project(x_ref_[...])
        g = start + jax.lax.broadcasted_iota(jnp.int32, (Bp, R, 1), 1)
        return jnp.where(seq_mask(g), p, 0.0)

    p_c = masked_project(xc_ref, t0)               # (Bp, Tt, M)  tile
    p_l = masked_project(xl_ref, t0 - HB)          # (Bp, HB, M)  left halo
    p_r = masked_project(xr_ref, t0 + Tt)          # (Bp, HB, M)  right halo

    # Zero-padded p window in VMEM: [left halo | tile | right halo].
    # Invalid halo rows (outside [0, seq_len)) are already zeroed by the mask.
    pbuf_ref[:, 0:HB, :] = p_l
    pbuf_ref[:, HB:HB + Tt, :] = p_c
    pbuf_ref[:, HB + Tt:HB + Tt + HB, :] = p_r

    # FIR + residual; center tap folded into the residual term.
    acc = p_c * (1.0 + f_ref[lctx, :][None, None, :])
    for j in range(-lctx, rctx + 1):
        if j == 0:
            continue
        acc = acc + (pbuf_ref[:, HB + j:HB + j + Tt, :]
                     * f_ref[j + lctx, :][None, None, :])

    mem_ref[...] = acc.astype(mem_ref.dtype)


def _choose_tiles(B, T, D, H, M, lctx, rctx, batch_block=None, time_tile=None):
    """Pick (batch_block, time_tile, halo_block) so rows/step >= 256 when possible
    and the per-step VMEM footprint stays well under the scoped limit."""
    HB = _round_up(max(lctx, rctx, 1), 8)
    if time_tile is not None:
        Tt = int(time_tile)
    elif T <= 512:
        Tt = T
    else:
        Tt = max(HB, (512 // HB) * HB)
    nt = pl.cdiv(T, Tt)
    if nt > 1:
        assert Tt % HB == 0, "time tile must be a multiple of the halo block"

    def vmem_est(bp):
        rows = bp * Tt
        x_b = 2 * bp * (Tt + 2 * HB) * D * 2       # bf16, double-buffered
        o_b = 2 * rows * M * 2                     # bf16, double-buffered
        pbuf = bp * (Tt + 2 * HB) * M * 4
        live = rows * (H + 3 * M) * 4              # h, p, acc, tap temp (f32)
        return x_b + o_b + pbuf + live

    if batch_block is not None:
        Bp = int(batch_block)
    else:
        budget = 20 * 1024 * 1024
        divisors = [d for d in range(1, B + 1) if B % d == 0]
        fitting = [d for d in divisors if vmem_est(d) <= budget] or [1]
        Bp = next((d for d in fitting if d * Tt >= 256), fitting[-1])
    assert B % Bp == 0
    return Bp, Tt, HB


def cfsmn_forward_pallas(x_bf16, seq_len, w1_bf16, b1_f32, w2_bf16, f_mat, *,
                         lctx, rctx, batch_block=None, time_tile=None,
                         out_dtype=jnp.bfloat16):
    B, T, D_in = x_bf16.shape
    H = w1_bf16.shape[1]
    M = w2_bf16.shape[1]
    K = f_mat.shape[0]

    Bp, Tt, HB = _choose_tiles(B, T, D_in, H, M, lctx, rctx,
                               batch_block=batch_block, time_tile=time_tile)
    nt = pl.cdiv(T, Tt)
    RT = Tt // HB                       # halo blocks per time tile
    nHB = pl.cdiv(T, HB)

    kern = functools.partial(_cfsmn_kernel, lctx=lctx, rctx=rctx, Bp=Bp,
                             Tt=Tt, HB=HB, T_total=T)

    xc_spec = pl.BlockSpec((Bp, Tt, D_in), lambda b, t, sl: (b, t, 0))
    xl_spec = pl.BlockSpec(
        (Bp, HB, D_in), lambda b, t, sl: (b, jnp.maximum(t * RT - 1, 0), 0))
    xr_spec = pl.BlockSpec(
        (Bp, HB, D_in),
        lambda b, t, sl: (b, jnp.minimum((t + 1) * RT, nHB - 1), 0))

    flops = 2 * B * T * (D_in * H + H * M) + 2 * B * T * M * (K + 1)
    bytes_accessed = (B * T * D_in * 2                       # x (bf16)
                      + 4 * B * nt * HB * D_in * 2           # halo re-reads
                      + B * T * M * 2                        # out (bf16)
                      + D_in * H * 2 + H * 4 + H * M * 2 + K * M * 4 + B * 4)

    return pl.pallas_call(
        kern,
        out_shape=jax.ShapeDtypeStruct((B, T, M), out_dtype),
        grid_spec=pltpu.PrefetchScalarGridSpec(
            num_scalar_prefetch=1,                 # seq_len -> SMEM
            grid=(B // Bp, nt),
            in_specs=[
                xc_spec,                                             # x tile
                xl_spec,                                             # x left halo
                xr_spec,                                             # x right halo
                pl.BlockSpec((D_in, H), lambda b, t, sl: (0, 0)),    # W1 (resident)
                pl.BlockSpec((1, H), lambda b, t, sl: (0, 0)),       # b1 (resident)
                pl.BlockSpec((H, M), lambda b, t, sl: (0, 0)),       # W2 (resident)
                pl.BlockSpec((K, M), lambda b, t, sl: (0, 0)),       # f_mat (resident)
            ],
            out_specs=pl.BlockSpec((Bp, Tt, M), lambda b, t, sl: (b, t, 0)),
            scratch_shapes=[pltpu.VMEM((Bp, Tt + 2 * HB, M), jnp.float32)],
        ),
        compiler_params=pltpu.CompilerParams(
            dimension_semantics=("parallel", "parallel"),
            vmem_limit_bytes=48 * 1024 * 1024),
        cost_estimate=pl.CostEstimate(flops=int(flops), transcendentals=0,
                                      bytes_accessed=int(bytes_accessed)),
    )(seq_len, x_bf16, x_bf16, x_bf16, w1_bf16, b1_f32, w2_bf16, f_mat)


# ----------------------------------------------------------------------------
# cFSMN layer wrapper (parameter setup + tiny glue in plain JAX)
# ----------------------------------------------------------------------------
class CFSMNLayerPallas:
    def __init__(self, key, input_dim, embed_dim, hid_dim, mem_dim,
                 look_back=5, look_ahead=5, stride_left=1, stride_right=1):
        self.input_dim = input_dim
        self.embed_dim = embed_dim
        self.hid_dim = hid_dim
        self.mem_dim = mem_dim
        self.look_back = look_back
        self.look_ahead = look_ahead
        self.stride_left = stride_left
        self.stride_right = stride_right

        lctx = look_back * stride_left
        rctx = look_ahead * stride_right
        self.lctx, self.rctx = lctx, rctx
        self.pad_len = max(lctx, rctx)
        self.left_offset = max(0, self.pad_len - lctx)
        self.right_offset = min(0, rctx - self.pad_len)

        k1, k2, k3, k4, k5, k6 = jax.random.split(key, 6)
        # nn.Linear-like deterministic init; matmul weights stored bf16 for MXU.
        lim1 = 1.0 / np.sqrt(input_dim)
        self.w_hid = jax.random.uniform(
            k1, (input_dim, hid_dim), minval=-lim1, maxval=lim1,
            dtype=jnp.float32).astype(jnp.bfloat16)
        self.b_hid = jax.random.uniform(
            k2, (1, hid_dim), minval=-lim1, maxval=lim1, dtype=jnp.float32)
        lim2 = 1.0 / np.sqrt(hid_dim)
        self.w_mem = jax.random.uniform(
            k3, (hid_dim, mem_dim), minval=-lim2, maxval=lim2,
            dtype=jnp.float32).astype(jnp.bfloat16)

        # xavier_uniform(gain=0.5) on [rows, mem_dim]; FIR math stays f32.
        def xavier(k, rows):
            bound = 0.5 * np.sqrt(6.0 / (rows + mem_dim))
            return jax.random.uniform(k, (rows, mem_dim),
                                      minval=-bound, maxval=bound,
                                      dtype=jnp.float32)

        self.left_factor = xavier(k4, look_back)
        self.cur_factor = xavier(k5, 1)
        self.right_factor = xavier(k6, look_ahead)

    def _build_f_mat(self):
        lctx, rctx = self.lctx, self.rctx
        f_mat = jnp.zeros((lctx + 1 + rctx, self.mem_dim), jnp.float32)
        f_mat = f_mat.at[0:lctx:self.stride_left].set(self.left_factor)
        f_mat = f_mat.at[lctx:lctx + 1].set(self.cur_factor)
        f_mat = f_mat.at[lctx + self.stride_right::self.stride_right].set(
            self.right_factor)
        return f_mat

    def __call__(self, inputs, embed, seq_len, is_training=False, *,
                 batch_block=None, time_tile=None):
        # inputs: [B, T, input_dim]; embed unused on the non-expert path.
        # Dropout is an eval-time no-op; upper_bound=None.
        del embed, is_training
        f_mat = self._build_f_mat()
        mem = cfsmn_forward_pallas(
            inputs.astype(jnp.bfloat16), seq_len.astype(jnp.int32),
            self.w_hid, self.b_hid, self.w_mem, f_mat,
            lctx=self.lctx, rctx=self.rctx,
            batch_block=batch_block, time_tile=time_tile)
        return mem, 0


# ----------------------------------------------------------------------------
# Pure-JAX reference mirroring the PyTorch forward (conv1d-as-cross-correlation
# with pad_len padding and the left/right offset slice), same bf16 matmuls.
# ----------------------------------------------------------------------------
def reference_forward(layer, inputs, seq_len):
    B, T, _ = inputs.shape
    seq_mask = (jnp.arange(T)[None, :] < seq_len[:, None]).astype(jnp.float32)

    hid = jnp.dot(inputs.astype(jnp.bfloat16), layer.w_hid,
                  preferred_element_type=jnp.float32) + layer.b_hid
    hid = jnp.maximum(hid, 0.0)
    p = jnp.dot(hid.astype(jnp.bfloat16), layer.w_mem,
                preferred_element_type=jnp.float32)
    p = p * seq_mask[..., None]

    f_mat = layer._build_f_mat()
    K = f_mat.shape[0]
    p_pad = jnp.pad(p, ((0, 0), (layer.pad_len, layer.pad_len), (0, 0)))
    conv_len = T + 2 * layer.pad_len - K + 1
    conv = sum(p_pad[:, k:k + conv_len, :] * f_mat[k][None, None, :]
               for k in range(K))
    mem = conv[:, layer.left_offset:conv_len + layer.right_offset, :] + p
    return mem


if __name__ == "__main__":
    key = jax.random.PRNGKey(0)
    input_dim, embed_dim, hid_dim, mem_dim = 128, 16, 128, 128  # lane-dense dims

    # (layer cfg, B, T, seq_lens, batch_block, time_tile)
    configs = [
        (dict(look_back=5, look_ahead=5, stride_left=1, stride_right=1),
         2, 64, (64, 37), None, 32),   # 2 time tiles -> real halo traffic
        (dict(look_back=3, look_ahead=5, stride_left=2, stride_right=1),
         2, 32, (32, 20), None, None),  # strided taps, single tile
        (dict(look_back=2, look_ahead=4, stride_left=1, stride_right=1),
         2, 64, (50, 64), 1, 32),      # rctx > lctx, per-batch grid steps
    ]

    for cfg, B, T, sl, bb, tt in configs:
        key, kp, kx, ke = jax.random.split(key, 4)
        layer = CFSMNLayerPallas(kp, input_dim, embed_dim, hid_dim, mem_dim, **cfg)

        inputs = jax.random.normal(kx, (B, T, input_dim), dtype=jnp.float32)
        embed = jax.random.normal(ke, (B, T, embed_dim), dtype=jnp.float32)
        seq_len = jnp.array(sl, dtype=jnp.int32)

        mem, aux = layer(inputs, embed, seq_len, batch_block=bb, time_tile=tt)
        mem = jax.block_until_ready(mem)

        ref = reference_forward(layer, inputs, seq_len)
        np.testing.assert_allclose(np.asarray(mem.astype(jnp.float32)),
                                   np.asarray(ref), rtol=2e-2, atol=2e-2)

    print("KERNEL_OK")
</pallas_src>

<mosaic_0001>
module attributes {stable_mosaic.version = 11 : i64} {
  func.func @_cfsmn_kernel(%arg0: i32, %arg1: i32, %arg2: memref<2xi32, #tpu.memory_space<smem>>, %arg3: memref<2x32x128xbf16, #tpu.memory_space<vmem>>, %arg4: memref<2x8x128xbf16, #tpu.memory_space<vmem>>, %arg5: memref<2x8x128xbf16, #tpu.memory_space<vmem>>, %arg6: memref<128x128xbf16, #tpu.memory_space<vmem>>, %arg7: memref<1x128xf32, #tpu.memory_space<vmem>>, %arg8: memref<128x128xbf16, #tpu.memory_space<vmem>>, %arg9: memref<11x128xf32, #tpu.memory_space<vmem>>, %arg10: memref<2x32x128xbf16, #tpu.memory_space<vmem>>, %arg11: memref<2x48x128xf32, #tpu.memory_space<vmem>>) attributes {dimension_semantics = [#tpu.dimension_semantics<parallel>, #tpu.dimension_semantics<parallel>], iteration_bounds = array<i64: 1, 2>, scalar_prefetch = 1 : i64, scratch_operands = 1 : i64, tpu.core_type = #tpu.core_type<tc>, window_params = [{transform_indices = @transform_0, window_bounds = array<i64: 2, 32, 128>}, {transform_indices = @transform_1, window_bounds = array<i64: 2, 8, 128>}, {transform_indices = @transform_2, window_bounds = array<i64: 2, 8, 128>}, {pipeline_mode = #tpu.pipeline_mode<synchronous>, transform_indices = @transform_3, window_bounds = array<i64: 128, 128>}, {pipeline_mode = #tpu.pipeline_mode<synchronous>, transform_indices = @transform_4, window_bounds = array<i64: 1, 128>}, {pipeline_mode = #tpu.pipeline_mode<synchronous>, transform_indices = @transform_5, window_bounds = array<i64: 128, 128>}, {pipeline_mode = #tpu.pipeline_mode<synchronous>, transform_indices = @transform_6, window_bounds = array<i64: 11, 128>}, {transform_indices = @transform_7, window_bounds = array<i64: 2, 32, 128>}]} {
    %c32_i32 = arith.constant 32 : i32
    %0 = arith.muli %arg1, %c32_i32 : i32
    %c0 = arith.constant 0 : index
    %c0_0 = arith.constant 0 : index
    %c0_1 = arith.constant 0 : index
    %1 = vector.load %arg3[%c0, %c0_0, %c0_1] : memref<2x32x128xbf16, #tpu.memory_space<vmem>>, vector<2x32x128xbf16>
    %2 = vector.shape_cast %1 : vector<2x32x128xbf16> to vector<64x128xbf16>
    %c0_2 = arith.constant 0 : index
    %c0_3 = arith.constant 0 : index
    %3 = vector.load %arg6[%c0_2, %c0_3] : memref<128x128xbf16, #tpu.memory_space<vmem>>, vector<128x128xbf16>
    %cst = arith.constant dense<0.000000e+00> : vector<64x128xf32>
    %4 = tpu.matmul %2, %3, %cst {dimension_numbers = #tpu.dot_dimension_numbers<[1], [0], [0], [1], [0, 0, 1, 1], [], []>} : vector<64x128xbf16>, vector<128x128xbf16>, vector<64x128xf32> -> vector<64x128xf32>
    %c0_4 = arith.constant 0 : index
    %c0_5 = arith.constant 0 : index
    %5 = vector.load %arg7[%c0_4, %c0_5] : memref<1x128xf32, #tpu.memory_space<vmem>>, vector<1x128xf32>
    %6 = vector.broadcast %5 : vector<1x128xf32> to vector<64x128xf32>
    %7 = arith.addf %4, %6 : vector<64x128xf32>
    %cst_6 = arith.constant 0.000000e+00 : f32
    %8 = vector.broadcast %cst_6 : f32 to vector<64x128xf32>
    %9 = arith.maximumf %7, %8 : vector<64x128xf32>
    %10 = arith.truncf %9 : vector<64x128xf32> to vector<64x128xbf16>
    %c0_7 = arith.constant 0 : index
    %c0_8 = arith.constant 0 : index
    %11 = vector.load %arg8[%c0_7, %c0_8] : memref<128x128xbf16, #tpu.memory_space<vmem>>, vector<128x128xbf16>
    %cst_9 = arith.constant dense<0.000000e+00> : vector<64x128xf32>
    %12 = tpu.matmul %10, %11, %cst_9 {dimension_numbers = #tpu.dot_dimension_numbers<[1], [0], [0], [1], [0, 0, 1, 1], [], []>} : vector<64x128xbf16>, vector<128x128xbf16>, vector<64x128xf32> -> vector<64x128xf32>
    %13 = vector.shape_cast %12 : vector<64x128xf32> to vector<2x32x128xf32>
    %14 = tpu.iota {dimensions = array<i32: 1>} : vector<2x32x1xi32>
    %15 = vector.broadcast %0 : i32 to vector<2x32x1xi32>
    %16 = arith.addi %15, %14 : vector<2x32x1xi32>
    %17 = tpu.iota {dimensions = array<i32: 0>} : vector<2x32x1xi32>
    %c0_i32 = arith.constant 0 : i32
    %18 = vector.broadcast %c0_i32 : i32 to vector<2x32x1xi32>
    %c2_i32 = arith.constant 2 : i32
    %19 = arith.muli %arg0, %c2_i32 : i32
    %20 = arith.index_cast %19 : i32 to index
    %21 = memref.load %arg2[%20] : memref<2xi32, #tpu.memory_space<smem>>
    %22 = vector.broadcast %21 : i32 to vector<2x32x1xi32>
    %23 = arith.addi %18, %22 : vector<2x32x1xi32>
    %c1_i32 = arith.constant 1 : i32
    %24 = vector.broadcast %c1_i32 : i32 to vector<2x32x1xi32>
    %25 = arith.cmpi eq, %17, %24 : vector<2x32x1xi32>
    %c2_i32_10 = arith.constant 2 : i32
    %26 = arith.muli %arg0, %c2_i32_10 : i32
    %c1_i32_11 = arith.constant 1 : i32
    %27 = arith.addi %26, %c1_i32_11 : i32
    %28 = arith.index_cast %27 : i32 to index
    %29 = memref.load %arg2[%28] : memref<2xi32, #tpu.memory_space<smem>>
    %30 = vector.broadcast %29 : i32 to vector<2x32x1xi32>
    %31 = arith.select %25, %30, %23 : vector<2x32x1xi1>, vector<2x32x1xi32>
    %c64_i32 = arith.constant 64 : i32
    %32 = vector.broadcast %c64_i32 : i32 to vector<2x32x1xi32>
    %33 = arith.minsi %31, %32 : vector<2x32x1xi32>
    %c0_i32_12 = arith.constant 0 : i32
    %34 = vector.broadcast %c0_i32_12 : i32 to vector<2x32x1xi32>
    %35 = arith.cmpi sge, %16, %34 : vector<2x32x1xi32>
    %36 = arith.cmpi slt, %16, %33 : vector<2x32x1xi32>
    %37 = arith.andi %35, %36 : vector<2x32x1xi1>
    %cst_13 = arith.constant 0.000000e+00 : f32
    %38 = vector.shape_cast %37 : vector<2x32x1xi1> to vector<2x32x1xi1>
    %39 = vector.broadcast %38 : vector<2x32x1xi1> to vector<2x32x128xi1>
    %40 = vector.broadcast %cst_13 : f32 to vector<2x32x128xf32>
    %41 = arith.select %39, %13, %40 : vector<2x32x128xi1>, vector<2x32x128xf32>
    %c8_i32 = arith.constant 8 : i32
    %42 = arith.subi %0, %c8_i32 : i32
    %c0_14 = arith.constant 0 : index
    %c0_15 = arith.constant 0 : index
    %c0_16 = arith.constant 0 : index
    %43 = vector.load %arg4[%c0_14, %c0_15, %c0_16] : memref<2x8x128xbf16, #tpu.memory_space<vmem>>, vector<2x8x128xbf16>
    %44 = vector.shape_cast %43 : vector<2x8x128xbf16> to vector<16x128xbf16>
    %c0_17 = arith.constant 0 : index
    %c0_18 = arith.constant 0 : index
    %45 = vector.load %arg6[%c0_17, %c0_18] : memref<128x128xbf16, #tpu.memory_space<vmem>>, vector<128x128xbf16>
    %cst_19 = arith.constant dense<0.000000e+00> : vector<16x128xf32>
    %46 = tpu.matmul %44, %45, %cst_19 {dimension_numbers = #tpu.dot_dimension_numbers<[1], [0], [0], [1], [0, 0, 1, 1], [], []>} : vector<16x128xbf16>, vector<128x128xbf16>, vector<16x128xf32> -> vector<16x128xf32>
    %c0_20 = arith.constant 0 : index
    %c0_21 = arith.constant 0 : index
    %47 = vector.load %arg7[%c0_20, %c0_21] : memref<1x128xf32, #tpu.memory_space<vmem>>, vector<1x128xf32>
    %48 = vector.broadcast %47 : vector<1x128xf32> to vector<16x128xf32>
    %49 = arith.addf %46, %48 : vector<16x128xf32>
    %cst_22 = arith.constant 0.000000e+00 : f32
    %50 = vector.broadcast %cst_22 : f32 to vector<16x128xf32>
    %51 = arith.maximumf %49, %50 : vector<16x128xf32>
    %52 = arith.truncf %51 : vector<16x128xf32> to vector<16x128xbf16>
    %c0_23 = arith.constant 0 : index
    %c0_24 = arith.constant 0 : index
    %53 = vector.load %arg8[%c0_23, %c0_24] : memref<128x128xbf16, #tpu.memory_space<vmem>>, vector<128x128xbf16>
    %cst_25 = arith.constant dense<0.000000e+00> : vector<16x128xf32>
    %54 = tpu.matmul %52, %53, %cst_25 {dimension_numbers = #tpu.dot_dimension_numbers<[1], [0], [0], [1], [0, 0, 1, 1], [], []>} : vector<16x128xbf16>, vector<128x128xbf16>, vector<16x128xf32> -> vector<16x128xf32>
    %55 = vector.shape_cast %54 : vector<16x128xf32> to vector<2x8x128xf32>
    %56 = tpu.iota {dimensions = array<i32: 1>} : vector<2x8x1xi32>
    %57 = vector.broadcast %42 : i32 to vector<2x8x1xi32>
    %58 = arith.addi %57, %56 : vector<2x8x1xi32>
    %59 = tpu.iota {dimensions = array<i32: 0>} : vector<2x8x1xi32>
    %c0_i32_26 = arith.constant 0 : i32
    %60 = vector.broadcast %c0_i32_26 : i32 to vector<2x8x1xi32>
    %c2_i32_27 = arith.constant 2 : i32
    %61 = arith.muli %arg0, %c2_i32_27 : i32
    %62 = arith.index_cast %61 : i32 to index
    %63 = memref.load %arg2[%62] : memref<2xi32, #tpu.memory_space<smem>>
    %64 = vector.broadcast %63 : i32 to vector<2x8x1xi32>
    %65 = arith.addi %60, %64 : vector<2x8x1xi32>
    %c1_i32_28 = arith.constant 1 : i32
    %66 = vector.broadcast %c1_i32_28 : i32 to vector<2x8x1xi32>
    %67 = arith.cmpi eq, %59, %66 : vector<2x8x1xi32>
    %c2_i32_29 = arith.constant 2 : i32
    %68 = arith.muli %arg0, %c2_i32_29 : i32
    %c1_i32_30 = arith.constant 1 : i32
    %69 = arith.addi %68, %c1_i32_30 : i32
    %70 = arith.index_cast %69 : i32 to index
    %71 = memref.load %arg2[%70] : memref<2xi32, #tpu.memory_space<smem>>
    %72 = vector.broadcast %71 : i32 to vector<2x8x1xi32>
    %73 = arith.select %67, %72, %65 : vector<2x8x1xi1>, vector<2x8x1xi32>
    %c64_i32_31 = arith.constant 64 : i32
    %74 = vector.broadcast %c64_i32_31 : i32 to vector<2x8x1xi32>
    %75 = arith.minsi %73, %74 : vector<2x8x1xi32>
    %c0_i32_32 = arith.constant 0 : i32
    %76 = vector.broadcast %c0_i32_32 : i32 to vector<2x8x1xi32>
    %77 = arith.cmpi sge, %58, %76 : vector<2x8x1xi32>
    %78 = arith.cmpi slt, %58, %75 : vector<2x8x1xi32>
    %79 = arith.andi %77, %78 : vector<2x8x1xi1>
    %cst_33 = arith.constant 0.000000e+00 : f32
    %80 = vector.shape_cast %79 : vector<2x8x1xi1> to vector<2x8x1xi1>
    %81 = vector.broadcast %80 : vector<2x8x1xi1> to vector<2x8x128xi1>
    %82 = vector.broadcast %cst_33 : f32 to vector<2x8x128xf32>
    %83 = arith.select %81, %55, %82 : vector<2x8x128xi1>, vector<2x8x128xf32>
    %c32_i32_34 = arith.constant 32 : i32
    %84 = arith.addi %0, %c32_i32_34 : i32
    %c0_35 = arith.constant 0 : index
    %c0_36 = arith.constant 0 : index
    %c0_37 = arith.constant 0 : index
    %85 = vector.load %arg5[%c0_35, %c0_36, %c0_37] : memref<2x8x128xbf16, #tpu.memory_space<vmem>>, vector<2x8x128xbf16>
    %86 = vector.shape_cast %85 : vector<2x8x128xbf16> to vector<16x128xbf16>
    %c0_38 = arith.constant 0 : index
    %c0_39 = arith.constant 0 : index
    %87 = vector.load %arg6[%c0_38, %c0_39] : memref<128x128xbf16, #tpu.memory_space<vmem>>, vector<128x128xbf16>
    %cst_40 = arith.constant dense<0.000000e+00> : vector<16x128xf32>
    %88 = tpu.matmul %86, %87, %cst_40 {dimension_numbers = #tpu.dot_dimension_numbers<[1], [0], [0], [1], [0, 0, 1, 1], [], []>} : vector<16x128xbf16>, vector<128x128xbf16>, vector<16x128xf32> -> vector<16x128xf32>
    %c0_41 = arith.constant 0 : index
    %c0_42 = arith.constant 0 : index
    %89 = vector.load %arg7[%c0_41, %c0_42] : memref<1x128xf32, #tpu.memory_space<vmem>>, vector<1x128xf32>
    %90 = vector.broadcast %89 : vector<1x128xf32> to vector<16x128xf32>
    %91 = arith.addf %88, %90 : vector<16x128xf32>
    %cst_43 = arith.constant 0.000000e+00 : f32
    %92 = vector.broadcast %cst_43 : f32 to vector<16x128xf32>
    %93 = arith.maximumf %91, %92 : vector<16x128xf32>
    %94 = arith.truncf %93 : vector<16x128xf32> to vector<16x128xbf16>
    %c0_44 = arith.constant 0 : index
    %c0_45 = arith.constant 0 : index
    %95 = vector.load %arg8[%c0_44, %c0_45] : memref<128x128xbf16, #tpu.memory_space<vmem>>, vector<128x128xbf16>
    %cst_46 = arith.constant dense<0.000000e+00> : vector<16x128xf32>
    %96 = tpu.matmul %94, %95, %cst_46 {dimension_numbers = #tpu.dot_dimension_numbers<[1], [0], [0], [1], [0, 0, 1, 1], [], []>} : vector<16x128xbf16>, vector<128x128xbf16>, vector<16x128xf32> -> vector<16x128xf32>
    %97 = vector.shape_cast %96 : vector<16x128xf32> to vector<2x8x128xf32>
    %98 = tpu.iota {dimensions = array<i32: 1>} : vector<2x8x1xi32>
    %99 = vector.broadcast %84 : i32 to vector<2x8x1xi32>
    %100 = arith.addi %99, %98 : vector<2x8x1xi32>
    %101 = tpu.iota {dimensions = array<i32: 0>} : vector<2x8x1xi32>
    %c0_i32_47 = arith.constant 0 : i32
    %102 = vector.broadcast %c0_i32_47 : i32 to vector<2x8x1xi32>
    %c2_i32_48 = arith.constant 2 : i32
    %103 = arith.muli %arg0, %c2_i32_48 : i32
    %104 = arith.index_cast %103 : i32 to index
    %105 = memref.load %arg2[%104] : memref<2xi32, #tpu.memory_space<smem>>
    %106 = vector.broadcast %105 : i32 to vector<2x8x1xi32>
    %107 = arith.addi %102, %106 : vector<2x8x1xi32>
    %c1_i32_49 = arith.constant 1 : i32
    %108 = vector.broadcast %c1_i32_49 : i32 to vector<2x8x1xi32>
    %109 = arith.cmpi eq, %101, %108 : vector<2x8x1xi32>
    %c2_i32_50 = arith.constant 2 : i32
    %110 = arith.muli %arg0, %c2_i32_50 : i32
    %c1_i32_51 = arith.constant 1 : i32
    %111 = arith.addi %110, %c1_i32_51 : i32
    %112 = arith.index_cast %111 : i32 to index
    %113 = memref.load %arg2[%112] : memref<2xi32, #tpu.memory_space<smem>>
    %114 = vector.broadcast %113 : i32 to vector<2x8x1xi32>
    %115 = arith.select %109, %114, %107 : vector<2x8x1xi1>, vector<2x8x1xi32>
    %c64_i32_52 = arith.constant 64 : i32
    %116 = vector.broadcast %c64_i32_52 : i32 to vector<2x8x1xi32>
    %117 = arith.minsi %115, %116 : vector<2x8x1xi32>
    %c0_i32_53 = arith.constant 0 : i32
    %118 = vector.broadcast %c0_i32_53 : i32 to vector<2x8x1xi32>
    %119 = arith.cmpi sge, %100, %118 : vector<2x8x1xi32>
    %120 = arith.cmpi slt, %100, %117 : vector<2x8x1xi32>
    %121 = arith.andi %119, %120 : vector<2x8x1xi1>
    %cst_54 = arith.constant 0.000000e+00 : f32
    %122 = vector.shape_cast %121 : vector<2x8x1xi1> to vector<2x8x1xi1>
    %123 = vector.broadcast %122 : vector<2x8x1xi1> to vector<2x8x128xi1>
    %124 = vector.broadcast %cst_54 : f32 to vector<2x8x128xf32>
    %125 = arith.select %123, %97, %124 : vector<2x8x128xi1>, vector<2x8x128xf32>
    %c0_55 = arith.constant 0 : index
    %c0_56 = arith.constant 0 : index
    %c0_57 = arith.constant 0 : index
    %126 = vector.load %arg11[%c0_55, %c0_56, %c0_57] : memref<2x48x128xf32, #tpu.memory_space<vmem>>, vector<2x8x128xf32>
    tpu.vector_store %arg11[%c0_55, %c0_56, %c0_57], %83 {strides = array<i32>} : memref<2x48x128xf32, #tpu.memory_space<vmem>>, vector<2x8x128xf32>,
    %c0_58 = arith.constant 0 : index
    %c8 = arith.constant 8 : index
    %c0_59 = arith.constant 0 : index
    %127 = vector.load %arg11[%c0_58, %c8, %c0_59] : memref<2x48x128xf32, #tpu.memory_space<vmem>>, vector<2x32x128xf32>
    tpu.vector_store %arg11[%c0_58, %c8, %c0_59], %41 {strides = array<i32>} : memref<2x48x128xf32, #tpu.memory_space<vmem>>, vector<2x32x128xf32>,
    %c0_60 = arith.constant 0 : index
    %c40 = arith.constant 40 : index
    %c0_61 = arith.constant 0 : index
    %128 = vector.load %arg11[%c0_60, %c40, %c0_61] : memref<2x48x128xf32, #tpu.memory_space<vmem>>, vector<2x8x128xf32>
    tpu.vector_store %arg11[%c0_60, %c40, %c0_61], %125 {strides = array<i32>} : memref<2x48x128xf32, #tpu.memory_space<vmem>>, vector<2x8x128xf32>,
    %c5 = arith.constant 5 : index
    %c0_62 = arith.constant 0 : index
    %129 = vector.load %arg9[%c5, %c0_62] : memref<11x128xf32, #tpu.memory_space<vmem>>, vector<1x128xf32>
    %130 = vector.shape_cast %129 : vector<1x128xf32> to vector<128xf32>
    %131 = vector.shape_cast %130 : vector<128xf32> to vector<1x1x128xf32>
    %cst_63 = arith.constant 1.000000e+00 : f32
    %132 = vector.broadcast %cst_63 : f32 to vector<1x1x128xf32>
    %133 = arith.addf %132, %131 : vector<1x1x128xf32>
    %134 = vector.broadcast %133 : vector<1x1x128xf32> to vector<2x32x128xf32>
    %135 = arith.mulf %41, %134 : vector<2x32x128xf32>
    %c0_64 = arith.constant 0 : index
    %c3 = arith.constant 3 : index
    %c0_65 = arith.constant 0 : index
    %136 = vector.load %arg11[%c0_64, %c3, %c0_65] : memref<2x48x128xf32, #tpu.memory_space<vmem>>, vector<2x32x128xf32>
    %c0_66 = arith.constant 0 : index
    %c0_67 = arith.constant 0 : index
    %137 = vector.load %arg9[%c0_66, %c0_67] : memref<11x128xf32, #tpu.memory_space<vmem>>, vector<1x128xf32>
    %138 = vector.shape_cast %137 : vector<1x128xf32> to vector<128xf32>
    %139 = vector.shape_cast %138 : vector<128xf32> to vector<1x1x128xf32>
    %140 = vector.broadcast %139 : vector<1x1x128xf32> to vector<2x32x128xf32>
    %141 = arith.mulf %136, %140 : vector<2x32x128xf32>
    %142 = arith.addf %135, %141 : vector<2x32x128xf32>
    %c0_68 = arith.constant 0 : index
    %c4 = arith.constant 4 : index
    %c0_69 = arith.constant 0 : index
    %143 = vector.load %arg11[%c0_68, %c4, %c0_69] : memref<2x48x128xf32, #tpu.memory_space<vmem>>, vector<2x32x128xf32>
    %c1 = arith.constant 1 : index
    %c0_70 = arith.constant 0 : index
    %144 = vector.load %arg9[%c1, %c0_70] : memref<11x128xf32, #tpu.memory_space<vmem>>, vector<1x128xf32>
    %145 = vector.shape_cast %144 : vector<1x128xf32> to vector<128xf32>
    %146 = vector.shape_cast %145 : vector<128xf32> to vector<1x1x128xf32>
    %147 = vector.broadcast %146 : vector<1x1x128xf32> to vector<2x32x128xf32>
    %148 = arith.mulf %143, %147 : vector<2x32x128xf32>
    %149 = arith.addf %142, %148 : vector<2x32x128xf32>
    %c0_71 = arith.constant 0 : index
    %c5_72 = arith.constant 5 : index
    %c0_73 = arith.constant 0 : index
    %150 = vector.load %arg11[%c0_71, %c5_72, %c0_73] : memref<2x48x128xf32, #tpu.memory_space<vmem>>, vector<2x32x128xf32>
    %c2 = arith.constant 2 : index
    %c0_74 = arith.constant 0 : index
    %151 = vector.load %arg9[%c2, %c0_74] : memref<11x128xf32, #tpu.memory_space<vmem>>, vector<1x128xf32>
    %152 = vector.shape_cast %151 : vector<1x128xf32> to vector<128xf32>
    %153 = vector.shape_cast %152 : vector<128xf32> to vector<1x1x128xf32>
    %154 = vector.broadcast %153 : vector<1x1x128xf32> to vector<2x32x128xf32>
    %155 = arith.mulf %150, %154 : vector<2x32x128xf32>
    %156 = arith.addf %149, %155 : vector<2x32x128xf32>
    %c0_75 = arith.constant 0 : index
    %c6 = arith.constant 6 : index
    %c0_76 = arith.constant 0 : index
    %157 = vector.load %arg11[%c0_75, %c6, %c0_76] : memref<2x48x128xf32, #tpu.memory_space<vmem>>, vector<2x32x128xf32>
    %c3_77 = arith.constant 3 : index
    %c0_78 = arith.constant 0 : index
    %158 = vector.load %arg9[%c3_77, %c0_78] : memref<11x128xf32, #tpu.memory_space<vmem>>, vector<1x128xf32>
    %159 = vector.shape_cast %158 : vector<1x128xf32> to vector<128xf32>
    %160 = vector.shape_cast %159 : vector<128xf32> to vector<1x1x128xf32>
    %161 = vector.broadcast %160 : vector<1x1x128xf32> to vector<2x32x128xf32>
    %162 = arith.mulf %157, %161 : vector<2x32x128xf32>
    %163 = arith.addf %156, %162 : vector<2x32x128xf32>
    %c0_79 = arith.constant 0 : index
    %c7 = arith.constant 7 : index
    %c0_80 = arith.constant 0 : index
    %164 = vector.load %arg11[%c0_79, %c7, %c0_80] : memref<2x48x128xf32, #tpu.memory_space<vmem>>, vector<2x32x128xf32>
    %c4_81 = arith.constant 4 : index
    %c0_82 = arith.constant 0 : index
    %165 = vector.load %arg9[%c4_81, %c0_82] : memref<11x128xf32, #tpu.memory_space<vmem>>, vector<1x128xf32>
    %166 = vector.shape_cast %165 : vector<1x128xf32> to vector<128xf32>
    %167 = vector.shape_cast %166 : vector<128xf32> to vector<1x1x128xf32>
    %168 = vector.broadcast %167 : vector<1x1x128xf32> to vector<2x32x128xf32>
    %169 = arith.mulf %164, %168 : vector<2x32x128xf32>
    %170 = arith.addf %163, %169 : vector<2x32x128xf32>
    %c0_83 = arith.constant 0 : index
    %c9 = arith.constant 9 : index
    %c0_84 = arith.constant 0 : index
    %171 = vector.load %arg11[%c0_83, %c9, %c0_84] : memref<2x48x128xf32, #tpu.memory_space<vmem>>, vector<2x32x128xf32>
    %c6_85 = arith.constant 6 : index
    %c0_86 = arith.constant 0 : index
    %172 = vector.load %arg9[%c6_85, %c0_86] : memref<11x128xf32, #tpu.memory_space<vmem>>, vector<1x128xf32>
    %173 = vector.shape_cast %172 : vector<1x128xf32> to vector<128xf32>
    %174 = vector.shape_cast %173 : vector<128xf32> to vector<1x1x128xf32>
    %175 = vector.broadcast %174 : vector<1x1x128xf32> to vector<2x32x128xf32>
    %176 = arith.mulf %171, %175 : vector<2x32x128xf32>
    %177 = arith.addf %170, %176 : vector<2x32x128xf32>
    %c0_87 = arith.constant 0 : index
    %c10 = arith.constant 10 : index
    %c0_88 = arith.constant 0 : index
    %178 = vector.load %arg11[%c0_87, %c10, %c0_88] : memref<2x48x128xf32, #tpu.memory_space<vmem>>, vector<2x32x128xf32>
    %c7_89 = arith.constant 7 : index
    %c0_90 = arith.constant 0 : index
    %179 = vector.load %arg9[%c7_89, %c0_90] : memref<11x128xf32, #tpu.memory_space<vmem>>, vector<1x128xf32>
    %180 = vector.shape_cast %179 : vector<1x128xf32> to vector<128xf32>
    %181 = vector.shape_cast %180 : vector<128xf32> to vector<1x1x128xf32>
    %182 = vector.broadcast %181 : vector<1x1x128xf32> to vector<2x32x128xf32>
    %183 = arith.mulf %178, %182 : vector<2x32x128xf32>
    %184 = arith.addf %177, %183 : vector<2x32x128xf32>
    %c0_91 = arith.constant 0 : index
    %c11 = arith.constant 11 : index
    %c0_92 = arith.constant 0 : index
    %185 = vector.load %arg11[%c0_91, %c11, %c0_92] : memref<2x48x128xf32, #tpu.memory_space<vmem>>, vector<2x32x128xf32>
    %c8_93 = arith.constant 8 : index
    %c0_94 = arith.constant 0 : index
    %186 = vector.load %arg9[%c8_93, %c0_94] : memref<11x128xf32, #tpu.memory_space<vmem>>, vector<1x128xf32>
    %187 = vector.shape_cast %186 : vector<1x128xf32> to vector<128xf32>
    %188 = vector.shape_cast %187 : vector<128xf32> to vector<1x1x128xf32>
    %189 = vector.broadcast %188 : vector<1x1x128xf32> to vector<2x32x128xf32>
    %190 = arith.mulf %185, %189 : vector<2x32x128xf32>
    %191 = arith.addf %184, %190 : vector<2x32x128xf32>
    %c0_95 = arith.constant 0 : index
    %c12 = arith.constant 12 : index
    %c0_96 = arith.constant 0 : index
    %192 = vector.load %arg11[%c0_95, %c12, %c0_96] : memref<2x48x128xf32, #tpu.memory_space<vmem>>, vector<2x32x128xf32>
    %c9_97 = arith.constant 9 : index
    %c0_98 = arith.constant 0 : index
    %193 = vector.load %arg9[%c9_97, %c0_98] : memref<11x128xf32, #tpu.memory_space<vmem>>, vector<1x128xf32>
    %194 = vector.shape_cast %193 : vector<1x128xf32> to vector<128xf32>
    %195 = vector.shape_cast %194 : vector<128xf32> to vector<1x1x128xf32>
    %196 = vector.broadcast %195 : vector<1x1x128xf32> to vector<2x32x128xf32>
    %197 = arith.mulf %192, %196 : vector<2x32x128xf32>
    %198 = arith.addf %191, %197 : vector<2x32x128xf32>
    %c0_99 = arith.constant 0 : index
    %c13 = arith.constant 13 : index
    %c0_100 = arith.constant 0 : index
    %199 = vector.load %arg11[%c0_99, %c13, %c0_100] : memref<2x48x128xf32, #tpu.memory_space<vmem>>, vector<2x32x128xf32>
    %c10_101 = arith.constant 10 : index
    %c0_102 = arith.constant 0 : index
    %200 = vector.load %arg9[%c10_101, %c0_102] : memref<11x128xf32, #tpu.memory_space<vmem>>, vector<1x128xf32>
    %201 = vector.shape_cast %200 : vector<1x128xf32> to vector<128xf32>
    %202 = vector.shape_cast %201 : vector<128xf32> to vector<1x1x128xf32>
    %203 = vector.broadcast %202 : vector<1x1x128xf32> to vector<2x32x128xf32>
    %204 = arith.mulf %199, %203 : vector<2x32x128xf32>
    %205 = arith.addf %198, %204 : vector<2x32x128xf32>
    %206 = arith.truncf %205 : vector<2x32x128xf32> to vector<2x32x128xbf16>
    %c0_103 = arith.constant 0 : index
    %c0_104 = arith.constant 0 : index
    %c0_105 = arith.constant 0 : index
    %207 = vector.load %arg10[%c0_103, %c0_104, %c0_105] : memref<2x32x128xbf16, #tpu.memory_space<vmem>>, vector<2x32x128xbf16>
    tpu.vector_store %arg10[%c0_103, %c0_104, %c0_105], %206 {strides = array<i32>} : memref<2x32x128xbf16, #tpu.memory_space<vmem>>, vector<2x32x128xbf16>,
    return
  }
  func.func @transform_0(%arg0: i32, %arg1: i32, %arg2: memref<2xi32, #tpu.memory_space<smem>>) -> (i32, i32, i32) {
    %c0_i32 = arith.constant 0 : i32
    %c0_i32_0 = arith.constant 0 : i32
    return %arg0, %arg1, %c0_i32 : i32, i32, i32
  }
  func.func @transform_1(%arg0: i32, %arg1: i32, %arg2: memref<2xi32, #tpu.memory_space<smem>>) -> (i32, i32, i32) {
    %c4_i32 = arith.constant 4 : i32
    %0 = arith.muli %arg1, %c4_i32 : i32
    %c1_i32 = arith.constant 1 : i32
    %1 = arith.subi %0, %c1_i32 : i32
    %c0_i32 = arith.constant 0 : i32
    %2 = arith.maxsi %1, %c0_i32 : i32
    %c0_i32_0 = arith.constant 0 : i32
    %c0_i32_1 = arith.constant 0 : i32
    return %arg0, %2, %c0_i32_0 : i32, i32, i32
  }
  func.func @transform_2(%arg0: i32, %arg1: i32, %arg2: memref<2xi32, #tpu.memory_space<smem>>) -> (i32, i32, i32) {
    %c1_i32 = arith.constant 1 : i32
    %0 = arith.addi %arg1, %c1_i32 : i32
    %c4_i32 = arith.constant 4 : i32
    %1 = arith.muli %0, %c4_i32 : i32
    %c7_i32 = arith.constant 7 : i32
    %2 = arith.minsi %1, %c7_i32 : i32
    %c0_i32 = arith.constant 0 : i32
    %c0_i32_0 = arith.constant 0 : i32
    return %arg0, %2, %c0_i32 : i32, i32, i32
  }
  func.func @transform_3(%arg0: i32, %arg1: i32, %arg2: memref<2xi32, #tpu.memory_space<smem>>) -> (i32, i32) {
    %c0_i32 = arith.constant 0 : i32
    %c0_i32_0 = arith.constant 0 : i32
    %c0_i32_1 = arith.constant 0 : i32
    return %c0_i32, %c0_i32_0 : i32, i32
  }
  func.func @transform_4(%arg0: i32, %arg1: i32, %arg2: memref<2xi32, #tpu.memory_space<smem>>) -> (i32, i32) {
    %c0_i32 = arith.constant 0 : i32
    %c0_i32_0 = arith.constant 0 : i32
    %c0_i32_1 = arith.constant 0 : i32
    return %c0_i32, %c0_i32_0 : i32, i32
  }
  func.func @transform_5(%arg0: i32, %arg1: i32, %arg2: memref<2xi32, #tpu.memory_space<smem>>) -> (i32, i32) {
    %c0_i32 = arith.constant 0 : i32
    %c0_i32_0 = arith.constant 0 : i32
    %c0_i32_1 = arith.constant 0 : i32
    return %c0_i32, %c0_i32_0 : i32, i32
  }
  func.func @transform_6(%arg0: i32, %arg1: i32, %arg2: memref<2xi32, #tpu.memory_space<smem>>) -> (i32, i32) {
    %c0_i32 = arith.constant 0 : i32
    %c0_i32_0 = arith.constant 0 : i32
    %c0_i32_1 = arith.constant 0 : i32
    return %c0_i32, %c0_i32_0 : i32, i32
  }
  func.func @transform_7(%arg0: i32, %arg1: i32, %arg2: memref<2xi32, #tpu.memory_space<smem>>) -> (i32, i32, i32) {
    %c0_i32 = arith.constant 0 : i32
    %c0_i32_0 = arith.constant 0 : i32
    return %arg0, %arg1, %c0_i32 : i32, i32, i32
  }
}

</mosaic_0001>

<bundles_post_ra>
// kernel: tpu_custom_call.1
= control target key start
LH: loop header
LB: loop body
LE: loop exit
PB: predicated region body
PF: predicated region fallthrough
CT: control target
= control target key end

     0   :  { %s3318_s0 = inlined_call_operand.hbm [shape: s32[2], index: 0, kind: input, shape index: {}]   ;;  %s3319_s1 = inlined_call_operand.hbm [shape: bf16[2,64,128], index: 1, kind: input, shape index: {}]   ;;  %s3320_s2 = inlined_call_operand.hbm [shape: bf16[2,64,128], index: 2, kind: input, shape index: {}]   ;;  %s3321_s3 = inlined_call_operand.hbm [shape: bf16[2,64,128], index: 3, kind: input, shape index: {}]   ;;  %s3322_s4 = inlined_call_operand.hbm [shape: bf16[128,128], index: 4, kind: input, shape index: {}]   ;;  %s3323_s5 = inlined_call_operand.vmem [shape: f32[1,128], index: 5, kind: input, shape index: {}]   ;;  %s3324_s6 = inlined_call_operand.hbm [shape: bf16[128,128], index: 6, kind: input, shape index: {}]   ;;  %s3325_s7 = inlined_call_operand.vmem [shape: f32[11,128], index: 7, kind: input, shape index: {}]   ;;  %s3326_s8 = inlined_call_operand.hbm [shape: bf16[2,64,128], index: 8, kind: output, shape index: {}]  }
   0x1   :  { %3354 = sst [smem:[#allocation40_spill]] %s3319_s1  ;;  %s2115_s29 = scalar_lea.hbm %s3318_s0, 16 }
   0x2   :  { %3355 = sst [smem:[#allocation41_spill]] %s3322_s4  ;;  %p2116_p0 = scmp.ne.s32.totalorder %s3318_s0, %s2115_s29 }
   0x3   :  { %3356 = sst [smem:[#allocation42_spill]] %s3323_s5  ;;  %p2119_p1 = scmp.lt.u32.totalorder %s2115_s29, %s3318_s0 }
   0x4   :  { %3357 = sst [smem:[#allocation43_spill]] %s3325_s7 }
   0x5   :  { %3358 = sst [smem:[#allocation44_spill]] %s3326_s8  ;;  %p2121_p2 = pnand %p2119_p1, %p2116_p0 }
   0x7   :  { %2124 = shalt.err (!%p2121_p2)  }
   0x8   :  { %s2355_s12 = smov [#allocation4]  }
   0x9   :  { %14 = dma.hbm_to_smem %s3318_s0, 16, %s2355_s12, [#allocation3] }
   0xa   :  { %2285 = dma.done.wait [#allocation3], 16 }
   0xb   :  { %2286 = vsyncadd [#allocation3], 4294967280 }
   0xc   :  { %16 = sfence }
   0xd   :  { %17 = vsyncpa [#allocation6], 0 }
   0xe   :  { %19 = vsyncpa [#allocation6 + $0x1], 0 }
   0xf   :  { %20 = vsyncpa [#allocation9], 0 }
  0x10   :  { %22 = vsyncpa [#allocation9 + $0x1], 0 }
  0x11   :  { %23 = vsyncpa [#allocation12], 0 }
  0x12   :  { %24 = vsyncpa [#allocation7], 0 }
  0x13   :  { %26 = vsyncpa [#allocation7 + $0x1], 0  ;;  %s2435_s15 = smov 0   ;;  %s2437_s16 = smov 0  }
  0x14   :  { %s2439_s17 = smov 0   ;;  %s2441_s18 = smov 0  }
  0x15   :  { %s2443_s19 = smov 0   ;;  %s2445_s0 = smov 0  }
  0x16   :  { %s2447_s20 = smov 0   ;;  %s2449_s21 = smov 0  }
  0x17   :  { %s2451_s22 = smov 0   ;;  %s2453_s23 = smov 0  }
  0x18   :  { %s2455_s24 = smov 0   ;;  %s2457_s25 = smov 0  }
  0x19 LB: > { %3359 = sst [smem:[#allocation26_spill]] %s2313_s16  ;;  %s2496_s26 = sadd.s32 4294967295, %s2353_s25   ;;  %s2353_s25 = sphi %s2457_s25, %s32_s25   ;;  %s2349_s24 = sphi %s2455_s24, %s3431_s24   ;;  %s2345_s23 = sphi %s2453_s23, %s3430_s23   ;;  %s2341_s22 = sphi %s2451_s22, %s3429_s22   ;;  %s2337_s21 = sphi %s2449_s21, %s3428_s21   ;;  %s2333_s20 = sphi %s2447_s20, %s3427_s20   ;;  %s2329_s0 = sphi %s2445_s0, %s3426_s0   ;;  %s2325_s19 = sphi %s2443_s19, %s3425_s19   ;;  %s2321_s18 = sphi %s2441_s18, %s3419_s18   ;;  %s2317_s17 = sphi %s2439_s17, %s3424_s17   ;;  %s2313_s16 = sphi %s2437_s16, %s3423_s16   ;;  %s2309_s15 = sphi %s2435_s15, %s3417_s15  }
  0x1a   : > { %3360 = sst [smem:[#allocation27_spill]] %s2325_s19  ;;  %s41_s28 = sadd.s32 1, %s2349_s24 }
  0x1b   : > { %3361 = sst [smem:[#allocation28_spill]] %s2333_s20  ;;  %s53_s29 = sadd.s32 1, %s2341_s22 }
  0x1c   : > { %3362 = sst [smem:[#allocation29_spill]] %s2345_s23  ;;  %p42_p3 = scmp.ge.s32.totalorder %s41_s28, 2 }
  0x1d   : > { %3363 = sst [smem:[#allocation30_spill]] %s2496_s26  ;;  %p60_p4 = scmp.ne.s32.totalorder %s2341_s22, %s2337_s21 }
  0x1e   : > { %p61_p5 = scmp.eq.s32.totalorder %s2353_s25, 0  ;;  %p3328_p6 = scmp.ne.s32.totalorder %s2337_s21, %s2333_s20 }
  0x1f   : > { %s3433_s28 = smov (%p42_p3, %s41_s28), 0  ;;  %p3343_p8 = scmp.eq.s32.totalorder %s2496_s26, 0 }
  0x20   : > { %3364 = sst [smem:[#allocation31_spill]] %s3433_s28  ;;  %p2513_p7 = por %p61_p5, %p60_p4 }
  0x21   : > { %s49_s9 = ssub.s32 %s2349_s24, %s3433_s28  ;;  %s1626_s10 = sshll.u32 %s2349_s24, 2 }
  0x22   : > { %s3365_s30 = scalar_select %p2513_p7, 1, 0 }
  0x23   : > { %p51_p9 = scmp.eq.s32.totalorder %s49_s9, 0  ;;  %p2526_p10 = por %p3343_p8, %p3328_p6 }
  0x24   : > { %s1627_s12 = sadd.s32 4294967295, %s1626_s10  ;;  %s1628_s13 = sshll.u32 %s3433_s28, 2 }
  0x25   : > { %s3366_s11 = scalar_select %p2526_p10, 1, 0 }
  0x26   : > { %s2532_s14 = scalar_select %p51_p9, %s2341_s22, %s53_s29  }
  0x27   : > { %3367 = sst [smem:[#allocation32_spill]] %s3366_s11  ;;  %p78_p11 = scmp.gt.s32.totalorder %s1627_s12, 0 }
  0x28   : > { %3368 = sst [smem:[#allocation33_spill]] %s2532_s14  ;;  %s1629_s27 = sadd.s32 4294967295, %s1628_s13 }
  0x29   : > { %p82_p12 = scmp.gt.s32.totalorder %s1629_s27, 0  ;;  %s89_s8 = sadd.s32 1, %s2329_s0 }
  0x2a   : > { %s3435_s12 = smov (!%p78_p11, %s1627_s12), 0  ;;  %p96_p13 = scmp.ne.s32.totalorder %s2329_s0, %s2325_s19 }
  0x2b   : > { %s3437_s27 = smov (!%p82_p12, %s1629_s27), 0  ;;  %p102_p0 = scmp.ne.s32.totalorder %s2325_s19, %s2321_s18 }
  0x2c   : > { %s85_s9 = ssub.s32 %s3435_s12, %s3437_s27  ;;  %s1705_s29 = sadd.s32 4, %s1626_s10 }
  0x2d   : > { %p87_p1 = scmp.eq.s32.totalorder %s85_s9, 0  ;;  %p2544_p2 = por %p96_p13, %p61_p5 }
  0x2e   : > { %p2550_p3 = por %p102_p0, %p3343_p8  ;;  %p114_p9 = scmp.lt.s32.totalorder %s1705_s29, 7 }
  0x2f   : > { %s3369_s28 = scalar_select %p2544_p2, 1, 0 }
  0x30   : > { %s3370_s14 = scalar_select %p2550_p3, 1, 0 }
  0x31   : > { %s2555_s18 = scalar_select %p87_p1, %s2329_s0, %s89_s8  }
  0x32   : > { %3371 = sst [smem:[#allocation34_spill]] %s3370_s14  ;;  %s3439_s29 = smov (!%p114_p9, %s1705_s29), 7 }
  0x33   : > { %3372 = sst [smem:[#allocation35_spill]] %s2555_s18  ;;  %s1707_s27 = sadd.s32 4, %s1628_s13 }
  0x34   : > { %s125_s10 = sadd.s32 1, %s2317_s17  ;;  %p118_p11 = scmp.lt.s32.totalorder %s1707_s27, 7 }
  0x35   : > { %p132_p12 = scmp.ne.s32.totalorder %s2317_s17, %s2313_s16  ;;  %p138_p13 = scmp.ne.s32.totalorder %s2313_s16, %s2309_s15 }
  0x36   : > { %p248_p0 = scmp.eq.s32.totalorder %s2496_s26, 1  ;;  %s3441_s27 = smov (!%p118_p11, %s1707_s27), 7 }
  0x37   : > { %p2567_p6 = por %p132_p12, %p61_p5  ;;  %p2573_p1 = por %p138_p13, %p3343_p8 }
  0x38   : > { %s121_s13 = ssub.s32 %s3439_s29, %s3441_s27  ;;  %p2581_p9 = por %p248_p0, %p60_p4 }
  0x39   : > { %s3373_s9 = scalar_select %p2567_p6, 1, 0 }
  0x3a   : > { %s3374_s8 = scalar_select %p2573_p1, 1, 0 }
  0x3b   : > { %s3376_s18 = scalar_select %p2581_p9, 1, 0 }
  0x3c   : > { %3375 = sst [smem:[#allocation36_spill]] %s3374_s8  ;;  %p123_p3 = scmp.eq.s32.totalorder %s121_s13, 0 }
  0x3d   : > { %3377 = sst [smem:[#allocation37_spill]] %s3376_s18  ;;  %s3378_s15 = sadd.s32 4294967294, %s2353_s25  }
  0x3e   : > { %p254_p11 = scmp.eq.s32.totalorder %s3378_s15, 1  ;;  %p1632_p10 = scmp.ge.s32.totalorder %s2353_s25, 1 }
  0x3f   : > { %p261_p2 = scmp.lt.s32.totalorder %s2353_s25, 3  ;;  %p3380_p5 = scmp.ne.s32.totalorder %s2337_s21, %s2333_s20 }
  0x40   : > { %s2590_s7 = scalar_select %p123_p3, %s2317_s17, %s125_s10  }
  0x41   : > { %p2595_p12 = por %p254_p11, %p3380_p5  ;;  %p2599_p13 = pnand %p1632_p10, %p261_p2 }
  0x42   : > { %3379 = sst [smem:[#allocation38_spill]] %s2590_s7  ;;  %s2356_s27 = smov [#allocation11]  }
  0x43   : > { %s3381_s23 = scalar_select %p2595_p12, 1, 0 }
  0x44   : > { %s3383_s5 = scalar_select %p2599_p13, 1, 0 }
  0x45   : > { %3382 = sst [smem:[#allocation39_spill]] %s3381_s23  ;;  %p1960_p4 = pneg %p2599_p13 }
  0x46   : > { %s273_s13 = sshll.u32 %s2356_s27, 4  ;;  %s2357_s10 = smov [#allocation13]   ;;  %s274_s13 = int_to_ptr.vmem [resolvable:$true] %s273_s13 }
  0x47   : > { %p2607_p0 = pnand %p1960_p4, %p3343_p8  ;;  %s289_s7 = sshll.u32 %s2357_s10, 4  ;;  %s290_s7 = int_to_ptr.vmem [resolvable:$true] %s289_s7 }
  0x48   : > { %s3385_s4 = sld [smem:[#allocation41_spill]] }
  0x49   : > { %p2127_p2 = pneg %p2607_p0 }
  0x4e   : > { %s2125_s18 = scalar_lea.hbm %s3385_s4, 1024 }
  0x4f   : > { %p2126_p10 = scmp.ne.s32.totalorder %s3385_s4, %s2125_s18  ;;  %p2132_p5 = scmp.lt.u32.totalorder %s2125_s18, %s3385_s4 }
  0x51   : > { %p2128_p3 = pnand %p2127_p2, %p2126_p10 }
  0x53   : > { %p2129_p11 = pneg %p2128_p3 }
  0x55   : > { %p2134_p4 = pnand %p2132_p5, %p2129_p11 }
  0x57   : > { %2137 = shalt.err (!%p2134_p4)
}
  0x58   : > { %s2138_s10 = scalar_lea.vmem %s274_s13, 1024  ;;  %p2146_p1 = scmp.lt.s32.totalorder %s274_s13, %s274_s13 }
  0x59   : > { %p2139_p8 = scmp.ne.s32.totalorder %s274_s13, %s2138_s10  ;;  %p2147_p13 = scmp.lt.s32.totalorder %s2138_s10, %s2138_s10 }
  0x5b   : > { %p2141_p12 = pnand %p2139_p8, %p2127_p2  ;;  %p2148_p6 = por %p2147_p13, %p2146_p1 }
  0x5d   : > { %p2142_p9 = pneg %p2141_p12 }
  0x5f   : > { %p2149_p7 = pnand %p2148_p6, %p2142_p9 }
  0x61   : > { %2152 = shalt.err (!%p2149_p7)
}
  0x62   : > { %s2358_s16 = smov 64   ;;  %s2359_s20 = smov 4  }
  0x63   : > { %1963 = dma.hbm_to_vmem [thread:$0]  (!%p2607_p0), %s3385_s4, 1024, %s274_s13, [#allocation12], %s2358_s16, %s2358_s16, %s2359_s20  }
  0x64   : > { %s2153_s27 = scalar_lea.hbm %s3324_s6, 1024 }
  0x65   : > { %p2154_p8 = scmp.ne.s32.totalorder %s3324_s6, %s2153_s27  ;;  %p2160_p1 = scmp.lt.u32.totalorder %s2153_s27, %s3324_s6 }
  0x67   : > { %p2156_p6 = pnand %p2154_p8, %p2127_p2 }
  0x69   : > { %p2157_p7 = pneg %p2156_p6 }
  0x6b   : > { %p2162_p9 = pnand %p2160_p1, %p2157_p7 }
  0x6d   : > { %2165 = shalt.err (!%p2162_p9)
}
  0x6e   : > { %s2166_s13 = scalar_lea.vmem %s290_s7, 1024  ;;  %p2174_p3 = scmp.lt.s32.totalorder %s290_s7, %s290_s7 }
  0x6f   : > { %p2167_p12 = scmp.ne.s32.totalorder %s290_s7, %s2166_s13  ;;  %p2175_p11 = scmp.lt.s32.totalorder %s2166_s13, %s2166_s13 }
  0x71   : > { %p2169_p13 = pnand %p2167_p12, %p2127_p2  ;;  %p2176_p5 = por %p2175_p11, %p2174_p3 }
  0x73   : > { %p2170_p10 = pneg %p2169_p13 }
  0x75   : > { %p2177_p4 = pnand %p2176_p5, %p2170_p10 }
  0x77   : > { %2180 = shalt.err (!%p2177_p4)
}
  0x78   : > { %1966 = dma.hbm_to_vmem [thread:$0]  (!%p2607_p0), %s3324_s6, 1024, %s290_s7, [#allocation12], %s2358_s16, %s2358_s16, %s2359_s20  }
  0x79   : > { %p1635_p8 = scmp.ge.s32.totalorder %s2353_s25, 2 }
  0x7b   : > { %302 = sbr.rel (%p1635_p8) target bundleno = 197 (0xc5), region = 32 }
  0x82   : > { %s306_s11 = sand.u32 1, %s2341_s22   ;;  %s1708_s15 = sshll.u32 %s2349_s24, 8 }
  0x83   : > { %s1636_s23 = sshll.u32 %s306_s11, 5  ;;  %p3386_p2 = scmp.ne.s32.totalorder %s3365_s30, 0 }
  0x84   : > { %s3387_s1 = sld [smem:[#allocation40_spill]]  ;;  %s310_s8 = scalar_lea.vmem [#allocation5], %s1636_s23 }
  0x85   : > { %s1935_s14 = scalar_select %p3386_p2, [#allocation0], [#allocation19] }
  0x86   : > { %s332_s27 = sshll.u32 %s310_s8, 4  ;;  %s2360_s10 = smov 512   ;;  %s333_s27 = int_to_ptr.vmem [resolvable:$true] %s332_s27 }
  0x87   : > { %s324_s20 = sld [smem:[%s1935_s14]]   ;;  %s2361_s13 = smov 256  }
  0x88   : > { %1936 = sst [smem:[#allocation16]] (%p3386_p2), %s2360_s10  ;;  %s2362_s19 = smov 4  }
  0x89   : > { %1937 = sst [smem:[#allocation16 + $0x1]] (%p3386_p2), %s2361_s13  ;;  %s2363_s26 = smov 64  }
  0x8a   : > { %s319_s16 = scalar_lea.hbm %s3387_s1, %s1708_s15  ;;  %1938 = sst [smem:[#allocation16 + $0x2]] (%p3386_p2), %s2362_s19 }
  0x8b   : > { %1939 = sst [smem:[#allocation16 + $0x3]] (%p3386_p2), %s2363_s26  ;;  %s307_s14 = scalar_lea.sflag [#allocation6], %s306_s11 }
  0x8c   : > { %1940 = sst [smem:[#allocation16 + $0x4]] (%p3386_p2), %s2363_s26  ;;  %s2364_s18 = smov [#allocation15]  }
  0x8d   : > { %s1639_s15 = sshll.u32 %s324_s20, 26  ;;  %1941 = sst [smem:[#allocation16 + $0x5]] (%p3386_p2), %s2362_s19 }
  0x8e   : > { %s1640_s23 = sadd.s32 134217728, %s1639_s15  ;;  %s355_s7 = sand.u32 1, %s2353_s25  }
  0x8f   : > { %1942 = dma.general (%p3386_p2), %s319_s16, 512, %s333_s27, %s307_s14, %s2364_s18, [#allocation16], %s1640_s23, 0  }
  0x90   : > { %s357_s8 = sand.u32 1, %s2329_s0   ;;  %s1644_s13 = sshll.u32 %s3435_s12, 6 }
  0x91   : > { %s1641_s10 = sshll.u32 %s357_s8, 3  ;;  %s2683_s26 = scalar_lea.hbm %s3320_s2, %s1644_s13 }
  0x92   : > { %s359_s11 = scalar_lea.vmem [#allocation8], %s1641_s10  ;;  %s2687_s16 = scalar_lea.sflag [#allocation9], %s355_s7 }
  0x93   : > { %s372_s30 = sshll.u32 %s359_s11, 4  ;;  %s2181_s20 = scalar_lea.hbm %s2683_s26, 128  ;;  %s2685_s30 = int_to_ptr.vmem [resolvable:$true] %s372_s30 }
  0x94   : > { %p2182_p0 = scmp.ne.s32.totalorder %s2683_s26, %s2181_s20  ;;  %p3388_p6 = scmp.ne.s32.totalorder %s3369_s28, 0 }
  0x95   : > { %s2185_s1 = scalar_lea.hbm %s3320_s2, 1024  ;;  %p2186_p9 = scmp.lt.u32.totalorder %s2683_s26, %s3320_s2 }
  0x96   : > { %p2183_p7 = pnand %p2182_p0, %p3388_p6  ;;  %p2187_p12 = scmp.lt.u32.totalorder %s2185_s1, %s2181_s20 }
  0x97   : > { %p2189_p10 = scmp.lt.u32.totalorder %s2181_s20, %s2683_s26 }
  0x98   : > { %p2184_p1 = pneg %p2183_p7  ;;  %p2188_p13 = por %p2187_p12, %p2186_p9 }
  0x9a   : > { %p2190_p3 = por %p2189_p10, %p2188_p13 }
  0x9c   : > { %p2191_p11 = pnand %p2190_p3, %p2184_p1 }
  0x9e   : > { %2194 = shalt.err (!%p2191_p11)
}
  0x9f   : > { %s2195_s15 = scalar_lea.vmem %s2685_s30, 128  ;;  %s2365_s23 = smov [#allocation8]  }
  0xa0   : > { %p2196_p5 = scmp.ne.s32.totalorder %s2685_s30, %s2195_s15  ;;  %s2199_s14 = sshll.u32 %s2365_s23, 4  ;;  %s2200_s14 = int_to_ptr.vmem [resolvable:$false] %s2199_s14 }
  0xa1   : > { %s2201_s18 = scalar_lea.vmem %s2200_s14, 256  ;;  %p2202_p0 = scmp.lt.s32.totalorder %s2685_s30, %s2200_s14 }
  0xa2   : > { %p2197_p4 = pnand %p2196_p5, %p3388_p6  ;;  %p2203_p7 = scmp.lt.s32.totalorder %s2201_s18, %s2195_s15 }
  0xa4   : > { %p2198_p2 = pneg %p2197_p4  ;;  %p2204_p9 = por %p2203_p7, %p2202_p0 }
  0xa6   : > { %p2205_p12 = pnand %p2204_p9, %p2198_p2 }
  0xa8   : > { %2208 = shalt.err (!%p2205_p12)
}
  0xa9   : > { %s2366_s7 = smov 512   ;;  %s2367_s8 = smov 64  }
  0xaa   : > { %s2368_s10 = smov 4   ;;  %s384_s13 = sand.u32 1, %s2317_s17  }
  0xab   : > { %1943 = dma.hbm_to_vmem [thread:$0]  (%p3388_p6), %s2683_s26, 128, %s2685_s30, %s2687_s16, %s2366_s7, %s2367_s8, %s2368_s10  }
  0xac   : > { %s1647_s11 = sshll.u32 %s3439_s29, 6  ;;  %s1645_s20 = sshll.u32 %s384_s13, 3 }
  0xad   : > { %s2719_s1 = scalar_lea.hbm %s3321_s3, %s1647_s11  ;;  %s386_s4 = scalar_lea.vmem [#allocation10], %s1645_s20 }
  0xae   : > { %s399_s19 = sshll.u32 %s386_s4, 4  ;;  %s2209_s28 = scalar_lea.hbm %s2719_s1, 128  ;;  %s2721_s19 = int_to_ptr.vmem [resolvable:$true] %s399_s19 }
  0xaf   : > { %p2210_p1 = scmp.ne.s32.totalorder %s2719_s1, %s2209_s28  ;;  %p3389_p13 = scmp.ne.s32.totalorder %s3373_s9, 0 }
  0xb0   : > { %s2213_s30 = scalar_lea.hbm %s3321_s3, 1024  ;;  %p2214_p3 = scmp.lt.u32.totalorder %s2719_s1, %s3321_s3 }
  0xb1   : > { %p2211_p6 = pnand %p2210_p1, %p3389_p13  ;;  %p2215_p11 = scmp.lt.u32.totalorder %s2213_s30, %s2209_s28 }
  0xb2   : > { %p2217_p4 = scmp.lt.u32.totalorder %s2209_s28, %s2719_s1 }
  0xb3   : > { %p2212_p10 = pneg %p2211_p6  ;;  %p2216_p5 = por %p2215_p11, %p2214_p3 }
  0xb5   : > { %p2218_p2 = por %p2217_p4, %p2216_p5 }
  0xb7   : > { %p2219_p0 = pnand %p2218_p2, %p2212_p10 }
  0xb9   : > { %2222 = shalt.err (!%p2219_p0)
}
  0xba   : > { %s2223_s14 = scalar_lea.vmem %s2721_s19, 128  ;;  %s2369_s18 = smov [#allocation10]  }
  0xbb   : > { %p2224_p7 = scmp.ne.s32.totalorder %s2721_s19, %s2223_s14  ;;  %s2227_s13 = sshll.u32 %s2369_s18, 4  ;;  %s2228_s13 = int_to_ptr.vmem [resolvable:$false] %s2227_s13 }
  0xbc   : > { %s2229_s11 = scalar_lea.vmem %s2228_s13, 256  ;;  %p2230_p1 = scmp.lt.s32.totalorder %s2721_s19, %s2228_s13 }
  0xbd   : > { %p2225_p9 = pnand %p2224_p7, %p3389_p13  ;;  %p2231_p6 = scmp.lt.s32.totalorder %s2229_s11, %s2223_s14 }
  0xbf   : > { %p2226_p12 = pneg %p2225_p9  ;;  %p2232_p3 = por %p2231_p6, %p2230_p1 }
  0xc1   : > { %p2233_p11 = pnand %p2232_p3, %p2226_p12 }
  0xc3   : > { %2236 = shalt.err (!%p2233_p11)
}
  0xc4   : > { %1944 = dma.hbm_to_vmem [thread:$0]  (%p3389_p13), %s2719_s1, 128, %s2721_s19, %s2687_s16, %s2366_s7, %s2367_s8, %s2368_s10  }
  0xc5 PF: > { %p3390_p10 = scmp.ne.s32.totalorder %s3383_s5, 0 }
  0xc6   : > { %s3391_s20 = sld [smem:[#allocation32_spill]] (!%p3390_p10)  ;;  %s2751_s12 = sand.u32 (!%p3390_p10), 1, %s2337_s21  }
  0xc7   : > { %411 = sbr.rel (%p3390_p10) target bundleno = 803 (0x323), region = 48  ;;  %s1649_s27 = sshll.u32 (!%p3390_p10), %s2751_s12, 5 }
  0xc8   : > { %s414_s9 = scalar_lea.sflag (!%p3390_p10), [#allocation6], %s2751_s12  ;;  %s2757_s4 = scalar_lea.vmem (!%p3390_p10), [#allocation5], %s1649_s27 }
  0xcc   : > { %p3392_p5 = scmp.ne.s32.totalorder (!%p3390_p10), %s3391_s20, 0 }
  0xce   : > { %2288 = dma.done.wait (%p3392_p5), %s414_s9, 512  }
  0xcf   : > { %2290 = vsyncadd (%p3392_p5), %s414_s9, 4294966784  ;;  %s3393_s16 = sld [smem:[#allocation30_spill]]  ;;  %s3394_s5 = sld [smem:[#allocation27_spill]] }
  0xd0   : > { %s3395_s7 = sld [smem:[#allocation34_spill]] }
  0xd5   : > { %s422_s8 = sand.u32 1, %s3393_s16   ;;  %s424_s10 = sand.u32 1, %s3394_s5  }
  0xd6   : > { %s2765_s1 = sshll.u32 %s424_s10, 3  ;;  %s423_s19 = scalar_lea.sflag [#allocation9], %s422_s8 }
  0xd7   : > { %s426_s28 = scalar_lea.vmem [#allocation8], %s2765_s1  ;;  %p3396_p13 = scmp.ne.s32.totalorder %s3395_s7, 0 }
  0xd9   : > { %2292 = dma.done.wait (%p3396_p13), %s423_s19, 128  }
  0xda   : > { %2294 = vsyncadd (%p3396_p13), %s423_s19, 4294967168  ;;  %s3397_s29 = sld [smem:[#allocation26_spill]]  ;;  %s3398_s26 = sld [smem:[#allocation36_spill]] }
  0xe0   : > { %s433_s30 = sand.u32 1, %s3397_s29   ;;  %p3399_p4 = scmp.ne.s32.totalorder %s3398_s26, 0 }
  0xe1   : > { %s2773_s15 = sshll.u32 %s433_s30, 3 }
  0xe2   : > { %s435_s23 = scalar_lea.vmem [#allocation10], %s2773_s15 }
  0xe3   : > { %2296 = dma.done.wait (%p3399_p4), %s423_s19, 128  }
  0xe4   : > { %2298 = vsyncadd (%p3399_p4), %s423_s19, 4294967168  ;;  %p3400_p2 = scmp.eq.s32.totalorder %s3393_s16, 0 }
  0xe6   : > { %2300 = dma.done.wait (%p3400_p2), [#allocation12], 2048   ;;  %p3401_p0 = pmov %p3400_p2 }
  0xe7   : > { %v2784_v0 = vld [vmem:[#allocation11] sm:$0xff]   ;;  %v2786_v1 = vld [vmem:[#allocation11 + $0x8] sm:$0xff]   ;;  %v2791_v2 = vld [vmem:[#allocation11 + $0x10] sm:$0xff]   ;;  %v2370_v17 = vmov 0.0   ;;  %vm2371_vm0 = vmmov 0   ;;  %s3402_s13 = sld [smem:[#allocation42_spill]] }
  0xe8   : > { %2302 = vsyncadd (%p3401_p0), [#allocation12], 4294965248  ;;  %1803 = vmatprep.subr.bf16.mxu0 %v2784_v0  ;;  %v2794_v3 = vld [vmem:[#allocation11 + $0x18] sm:$0xff]   ;;  %v2101_v4 = vld [vmem:[%s2757_s4] sm:$0xff]   ;;  %s3403_s11 = sld [smem:[#allocation29_spill]]  ;;  %s820_s20 = sld [smem:[#allocation4]] }
  0xe9   : > { %1804 = vmatpush3.bf16.msra.mxu0 %v2784_v0  ;;  %1819 = vmatprep.mubr.bf16.mxu0 %v2101_v4  ;;  %v2800_v5 = vld [vmem:[#allocation11 + $0x20] sm:$0xff]   ;;  %v2805_v7 = vld [vmem:[#allocation13 + $0x8] sm:$0xff]   ;;  %v2813_v9 = vld [vmem:[#allocation13 + $0x10] sm:$0xff]   ;;  %s3404_s7 = sld [smem:[#allocation43_spill]] }
  0xea   : > { %1805 = vmatprep.subr.bf16.mxu0 %v2786_v1  ;;  %v2802_v6 = vld [vmem:[#allocation13] sm:$0xff]   ;;  %v2808_v8 = vld [vmem:[#allocation11 + $0x28] sm:$0xff]   ;;  %v2099_v10 = vld [vmem:[#allocation11 + $0x30] sm:$0xff]  }
  0xeb   : > { %1827 = vmatprep.subr.bf16.mxu1 %v2802_v6  ;;  %v2819_v11 = vld [vmem:[#allocation13 + $0x18] sm:$0xff]   ;;  %v2824_v13 = vld [vmem:[#allocation13 + $0x20] sm:$0xff]   ;;  %v2102_v14 = vld [vmem:[%s2757_s4 + $0x8] sm:$0xff]  }
  0xec   : > { %1828 = vmatpush3.bf16.msra.mxu1 %v2802_v6  ;;  %v2100_v12 = vld [vmem:[#allocation11 + $0x38] sm:$0xff]   ;;  %v2829_v15 = vld [vmem:[#allocation13 + $0x28] sm:$0xff]   ;;  %v2103_v16 = vld [vmem:[%s2757_s4 + $0x10] sm:$0xff]  }
  0xed   : > { %1806 = vmatpush3.bf16.msra.mxu0 %v2786_v1  ;;  %1829 = vmatprep.subr.bf16.mxu1 %v2805_v7  ;;  %v2104_v18 = vld [vmem:[%s2757_s4 + $0x18] sm:$0xff]   ;;  %v2105_v19 = vld [vmem:[%s426_s28] sm:$0xff]   ;;  %v2872_v21 = vld [vmem:[#allocation13 + $0x30] sm:$0xff]   ;;  %s1677_s4 = sld [smem:[#allocation4 + $0x1]]  ;;  %s3217_s28 = scalar_lea.vmem [#allocation14], %s1649_s27 }
  0xee   : > { %1807 = vmatprep.subr.bf16.mxu0 %v2791_v2  ;;  %v2106_v20 = vld [vmem:[%s435_s23] sm:$0xff]   ;;  %s2936_s9 = sshll.u32 %s3403_s11, 5  ;;  %s1426_s27 = scalar_lea.sflag [#allocation7], %s2751_s12 }
  0xef   : > { %v2876_v22 = vld [vmem:[#allocation13 + $0x38] sm:$0xff]   ;;  %v2884_v23 = vld [vmem:[%s3402_s13] ss:$0 sm:$0xff]  ;;  %s1678_s8 = sadd.s32 4294967288, %s2936_s9 }
  0xf0   : > { %1830 = vmatpush3.bf16.msra.mxu1 %v2805_v7 }
  0xf1   : > { %1808 = vmatpush3.bf16.msra.mxu0 %v2791_v2  ;;  %1831 = vmatprep.subr.bf16.mxu1 %v2813_v9 }
  0xf2   : > { %1809 = vmatprep.subr.bf16.mxu0 %v2794_v3 }
  0xf4   : > { %1832 = vmatpush3.bf16.msra.mxu1 %v2813_v9 }
  0xf5   : > { %1810 = vmatpush3.bf16.msra.mxu0 %v2794_v3  ;;  %1833 = vmatprep.subr.bf16.mxu1 %v2819_v11 }
  0xf6   : > { %1811 = vmatprep.subr.bf16.mxu0 %v2800_v5 }
  0xf8   : > { %1834 = vmatpush3.bf16.msra.mxu1 %v2819_v11 }
  0xf9   : > { %1812 = vmatpush3.bf16.msra.mxu0 %v2800_v5  ;;  %1835 = vmatprep.subr.bf16.mxu1 %v2824_v13 }
  0xfa   : > { %1813 = vmatprep.subr.bf16.mxu0 %v2808_v8 }
  0xfc   : > { %1836 = vmatpush3.bf16.msra.mxu1 %v2824_v13 }
  0xfd   : > { %1814 = vmatpush3.bf16.msra.mxu0 %v2808_v8  ;;  %1837 = vmatprep.subr.bf16.mxu1 %v2829_v15 }
  0xfe   : > { %1815 = vmatprep.subr.bf16.mxu0 %v2099_v10 }
 0x100   : > { %1838 = vmatpush3.bf16.msra.mxu1 %v2829_v15 }
 0x101   : > { %1816 = vmatpush3.bf16.msra.mxu0 %v2099_v10  ;;  %1839 = vmatprep.subr.bf16.mxu1 %v2872_v21 }
 0x102   : > { %1817 = vmatprep.subr.bf16.mxu0 %v2100_v12 }
 0x104   : > { %1840 = vmatpush3.bf16.msra.mxu1 %v2872_v21 }
 0x105   : > { %1818 = vmatpush3.bf16.msra.mxu0 %v2100_v12  ;;  %1841 = vmatprep.subr.bf16.mxu1 %v2876_v22 }
 0x106   : > { %1851 = vmatprep.subr.bf16.mxu0 %v2370_v17 }
 0x108   : > { %1820 = vmatmul.mubr.bf16.vlgmr.msra.gmra.mrb[0].mxu0 %v2102_v14  ;;  %1842 = vmatpush3.bf16.msra.mxu1 %v2876_v22 }
 0x109   : > { %1852 = vmatpush3.bf16.msra.mxu0 %v2784_v0  ;;  %1823 = vmatprep.mubr.bf16.mxu0 %v2103_v16 }
 0x10a   : > { %1853 = vmatprep.subr.bf16.mxu0 %v2370_v17  ;;  %1871 = vmatprep.subr.bf16.mxu1 %v2370_v17 }
 0x10d   : > { %1854 = vmatpush3.bf16.msra.mxu0 %v2786_v1 }
 0x10e   : > { %1855 = vmatprep.subr.bf16.mxu0 %v2370_v17 }
 0x110   : > { %1824 = vmatmul.mubr.bf16.gmra.mrb[4].mxu0 %v2104_v18  ;;  %v824_v18 = vstv %s1677_s4 }
 0x111   : > { %1856 = vmatpush3.bf16.msra.mxu0 %v2791_v2  ;;  %1867 = vmatprep.mubr.msk.bf16.mxu0 %vm2371_vm0, %v2370_v17  ;;  %vm827_vm8 = vcmp.lt.s32.totalorder %v824_v18, 64 }
 0x112   : > { %1857 = vmatprep.subr.bf16.mxu0 %v2370_v17 }
 0x115   : > { %1858 = vmatpush3.bf16.msra.mxu0 %v2794_v3 }
 0x116   : > { %1859 = vmatprep.subr.bf16.mxu0 %v2370_v17 }
 0x119   : > { %1860 = vmatpush3.bf16.msra.mxu0 %v2800_v5 }
 0x11a   : > { %1861 = vmatprep.subr.bf16.mxu0 %v2370_v17 }
 0x11d   : > { %1862 = vmatpush3.bf16.msra.mxu0 %v2808_v8 }
 0x11e   : > { %1863 = vmatprep.subr.bf16.mxu0 %v2370_v17 }
 0x121   : > { %1864 = vmatpush3.bf16.msra.mxu0 %v2099_v10 }
 0x122   : > { %1865 = vmatprep.subr.bf16.mxu0 %v2370_v17 }
 0x125   : > { %1866 = vmatpush3.bf16.msra.mxu0 %v2100_v12 }
 0x126   : > { %1891 = vmatprep.subr.bf16.mxu0 %v2370_v17 }
 0x128   : > { %1868 = vmatmul.mubr.bf16.vlgmr.msra.gmra.mrb[8].mxu0 %v2105_v19 }
 0x129   : > { %1892 = vmatpush3.bf16.msra.mxu0 %v2784_v0  ;;  %1907 = vmatprep.mubr.msk.bf16.mxu0 %vm2371_vm0, %v2370_v17 }
 0x12a   : > { %1893 = vmatprep.subr.bf16.mxu0 %v2370_v17 }
 0x12d   : > { %1894 = vmatpush3.bf16.msra.mxu0 %v2786_v1 }
 0x12e   : > { %1895 = vmatprep.subr.bf16.mxu0 %v2370_v17 }
 0x131   : > { %1896 = vmatpush3.bf16.msra.mxu0 %v2791_v2 }
 0x132   : > { %1897 = vmatprep.subr.bf16.mxu0 %v2370_v17 }
 0x135   : > { %1898 = vmatpush3.bf16.msra.mxu0 %v2794_v3 }
 0x136   : > { %1899 = vmatprep.subr.bf16.mxu0 %v2370_v17 }
 0x139   : > { %1900 = vmatpush3.bf16.msra.mxu0 %v2800_v5 }
 0x13a   : > { %1901 = vmatprep.subr.bf16.mxu0 %v2370_v17 }
 0x13d   : > { %1902 = vmatpush3.bf16.msra.mxu0 %v2808_v8  ;;  %v821_v8 = vstv %s820_s20  ;;  %s980_s20 = sadd.s32 32, %s2936_s9 }
 0x13e   : > { %1903 = vmatprep.subr.bf16.mxu0 %v2370_v17  ;;  %vm825_vm1 = vcmp.lt.s32.totalorder %v821_v8, 64 }
 0x13f   : > { %v2942_v14 = vsel %vm825_vm1, %v821_v8, 64 }
 0x141   : > { %1904 = vmatpush3.bf16.msra.mxu0 %v2099_v10  ;;  %v814_v10 = vstv %s2936_s9 }
 0x142   : > { %1905 = vmatprep.subr.bf16.mxu0 %v2370_v17 }
 0x145   : > { %1906 = vmatpush3.bf16.msra.mxu0 %v2100_v12 }
 0x148   : > { %1908 = vmatmul.mubr.bf16.vlgmr.msra.gmra.mrb[12].mxu0 %v2106_v20  ;;  %v2952_v20 = vsel %vm827_vm8, %v824_v18, 64 }
 0x1db   : > { %v1821_v24 = vpop.f32.mrb[0].mxu0 }
 0x1dc   : > { %v646_v25 = vadd.f32 %v1821_v24, %v2884_v23  ;;  %v637_v26 = vpop.f32.mrb[1].mxu0 }
 0x1dd   : > { %v638_v27 = vadd.f32 %v2884_v23, %v637_v26  ;;  %v1822_v28 = vpop.f32.mrb[2].mxu0 }
 0x1de   : > { %v649_v29 = vadd.f32 %v1822_v28, %v2884_v23  ;;  %v640_v30 = vpop.f32.mrb[3].mxu0  ;;  %v670_v32 = vmax.f32 %v646_v25, 0.0 }
 0x1df   : > { %v641_v31 = vadd.f32 %v2884_v23, %v640_v30  ;;  %v668_v34 = vmax.f32 %v638_v27, 0.0 }
 0x1e0   : > { %v671_v33 = vmax.f32 %v649_v29, 0.0 }
 0x1e1   : > { %v669_v35 = vmax.f32 %v641_v31, 0.0 }
 0x1e2   : > { %v677_v36 = vpack.c.bf16 %v671_v33, %v670_v32 }
 0x1e3   : > { %v1825_v37 = vpop.f32.mrb[4].mxu0  ;;  %v676_v38 = vpack.c.bf16 %v669_v35, %v668_v34  ;;  %v1099_v35 = vld [vmem:[%s3404_s7 + $0x5] sm:$0x1] }
 0x1e4   : > { %v662_v39 = vadd.f32 %v1825_v37, %v2884_v23  ;;  %v653_v40 = vpop.f32.mrb[5].mxu0 }
 0x1e5   : > { %v654_v41 = vadd.f32 %v2884_v23, %v653_v40  ;;  %v1826_v42 = vpop.f32.mrb[6].mxu0  ;;  %1843 = vmatprep.mubr.bf16.mxu1 %v676_v38  ;;  %v2987_v38 = vld [vmem:[%s3404_s7] ss:$0 sm:$0xff]  ;;  %v967_v40 = vstv %s1678_s8 }
 0x1e6   : > { %v674_v43 = vmax.f32 %v662_v39, 0.0  ;;  %v665_v44 = vadd.f32 %v1826_v42, %v2884_v23  ;;  %v656_v45 = vpop.f32.mrb[7].mxu0  ;;  %1844 = vmatmul.mubr.bf16.vlgmr.msra.gmra.mrb[0].mxu1 %v677_v36  ;;  %v1100_v36 = vadd.f32 1.0, %v1099_v35 }
 0x1e7   : > { %v672_v46 = vmax.f32 %v654_v41, 0.0  ;;  %v657_v47 = vadd.f32 %v2884_v23, %v656_v45  ;;  %1872 = vmatpush3.bf16.msra.mxu1 %v2802_v6  ;;  %v3002_v45 = vld [vmem:[%s3404_s7 + $0x1] ss:$0 sm:$0xff] }
 0x1e8   : > { %v675_v48 = vmax.f32 %v665_v44, 0.0  ;;  %1873 = vmatprep.subr.bf16.mxu1 %v2370_v17 }
 0x1e9   : > { %v673_v49 = vmax.f32 %v657_v47, 0.0 }
 0x1ea   : > { %v679_v50 = vpack.c.bf16 %v675_v48, %v674_v43 }
 0x1eb   : > { %v678_v51 = vpack.c.bf16 %v673_v49, %v672_v46  ;;  %1874 = vmatpush3.bf16.msra.mxu1 %v2805_v7 }
 0x1ec   : > { %1875 = vmatprep.subr.bf16.mxu1 %v2370_v17 }
 0x1ed   : > { %1847 = vmatprep.mubr.bf16.mxu1 %v678_v51 }
 0x1ee   : > { %1848 = vmatmul.mubr.bf16.gmra.mrb[4].mxu1 %v679_v50  ;;  %v3012_v50 = vld [vmem:[%s3404_s7 + $0x2] ss:$0 sm:$0xff] }
 0x1ef   : > { %1876 = vmatpush3.bf16.msra.mxu1 %v2813_v9  ;;  %1887 = vmatprep.mubr.msk.bf16.mxu1 %vm2371_vm0, %v2370_v17 }
 0x1f0   : > { %1877 = vmatprep.subr.bf16.mxu1 %v2370_v17 }
 0x1f3   : > { %1878 = vmatpush3.bf16.msra.mxu1 %v2819_v11 }
 0x1f4   : > { %1879 = vmatprep.subr.bf16.mxu1 %v2370_v17 }
 0x1f7   : > { %1880 = vmatpush3.bf16.msra.mxu1 %v2824_v13 }
 0x1f8   : > { %1881 = vmatprep.subr.bf16.mxu1 %v2370_v17 }
 0x1fb   : > { %1882 = vmatpush3.bf16.msra.mxu1 %v2829_v15  ;;  %v916_v52 = vpop.f32.mrb[8].mxu0 }
 0x1fc   : > { %v917_v53 = vadd.f32 %v2884_v23, %v916_v52  ;;  %v1869_v54 = vpop.f32.mrb[9].mxu0  ;;  %1883 = vmatprep.subr.bf16.mxu1 %v2370_v17 }
 0x1fd   : > { %v919_v55 = vpop.f32.mrb[10].mxu0  ;;  %v3022_v54 = vld [vmem:[%s3404_s7 + $0x3] ss:$0 sm:$0xff] }
 0x1fe   : > { %v923_v56 = vmax.f32 %v917_v53, 0.0  ;;  %v920_v57 = vadd.f32 %v2884_v23, %v919_v55  ;;  %v1870_v58 = vpop.f32.mrb[11].mxu0 }
 0x1ff   : > { %1884 = vmatpush3.bf16.msra.mxu1 %v2872_v21 }
 0x200   : > { %v924_v59 = vmax.f32 %v920_v57, 0.0  ;;  %1885 = vmatprep.subr.bf16.mxu1 %v2370_v17 }
 0x202   : > { %v925_v60 = vpack.c.bf16 %v924_v59, %v923_v56 }
 0x203   : > { %1886 = vmatpush3.bf16.msra.mxu1 %v2876_v22 }
 0x204   : > { %1911 = vmatprep.subr.bf16.mxu1 %v2370_v17 }
 0x206   : > { %1888 = vmatmul.mubr.bf16.vlgmr.msra.gmra.mrb[8].mxu1 %v925_v60 }
 0x207   : > { %1912 = vmatpush3.bf16.msra.mxu1 %v2802_v6  ;;  %1927 = vmatprep.mubr.msk.bf16.mxu1 %vm2371_vm0, %v2370_v17  ;;  %v809_v6 = vlaneseq }
 0x208   : > { %1913 = vmatprep.subr.bf16.mxu1 %v2370_v17 }
 0x20b   : > { %1914 = vmatpush3.bf16.msra.mxu1 %v2805_v7  ;;  %v2933_v7 = vshrl.u32 %v809_v6, 7  ;;  %v3042_v6 = vld [vmem:[%s3404_s7 + $0x4] ss:$0 sm:$0xff] }
 0x20c   : > { %1915 = vmatprep.subr.bf16.mxu1 %v2370_v17 }
 0x20d   : > { %v811_v12 = vadd.s32 8, %v2933_v7  ;;  %v1103_v37 = vsub.s32 0, %v2933_v7  ;;  %v968_v44 = vadd.s32 %v967_v40, %v2933_v7 }
 0x20f   : > { %1916 = vmatpush3.bf16.msra.mxu1 %v2813_v9  ;;  %v812_v9 = vadd.s32 16, %v2933_v7  ;;  %v2992_v41 = vrot.slane %v1100_v36, %v1103_v37  ;;  %vm970_vm8 = vcmp.lt.s32.totalorder %v968_v44, %v2942_v14 }
 0x210   : > { %1917 = vmatprep.subr.bf16.mxu1 %v2370_v17 }
 0x213   : > { %1918 = vmatpush3.bf16.msra.mxu1 %v2819_v11  ;;  %v813_v11 = vadd.s32 24, %v2933_v7 }
 0x214   : > { %1919 = vmatprep.subr.bf16.mxu1 %v2370_v17 }
 0x215   : > { %v818_v16 = vadd.s32 %v814_v10, %v813_v11 }
 0x217   : > { %1920 = vmatpush3.bf16.msra.mxu1 %v2824_v13  ;;  %v817_v13 = vadd.s32 %v814_v10, %v812_v9  ;;  %vm832_vm6 = vcmp.ge.s32.totalorder %v818_v16, 0  ;;  %vm836_vm7 = vcmp.lt.s32.totalorder %v818_v16, %v2942_v14  ;;  %vm840_vm1 = vcmp.lt.s32.totalorder %v818_v16, %v2952_v20 }
 0x218   : > { %1921 = vmatprep.subr.bf16.mxu1 %v2370_v17  ;;  %vm844_vm13 = vmand %vm832_vm6, %vm836_vm7 }
 0x219   : > { %vm831_vm2 = vcmp.ge.s32.totalorder %v817_v13, 0  ;;  %vm835_vm3 = vcmp.lt.s32.totalorder %v817_v13, %v2942_v14  ;;  %vm839_vm15 = vcmp.lt.s32.totalorder %v817_v13, %v2952_v20  ;;  %vm848_vm7 = vmand %vm832_vm6, %vm840_vm1  ;;  %vm969_vm6 = vcmp.ge.s32.totalorder %v968_v44, 0  ;;  %v3106_v13 = vld [vmem:[%s3404_s7 + $0x8] ss:$0 sm:$0xff] }
 0x21a   : > { %vm843_vm9 = vmand %vm831_vm2, %vm835_vm3 }
 0x21b   : > { %1922 = vmatpush3.bf16.msra.mxu1 %v2829_v15  ;;  %v1023_v61 = vpop.f32.mrb[12].mxu0  ;;  %v815_v15 = vadd.s32 %v814_v10, %v2933_v7  ;;  %vm847_vm3 = vmand %vm831_vm2, %vm839_vm15 }
 0x21c   : > { %v1024_v62 = vadd.f32 %v2884_v23, %v1023_v61  ;;  %v1909_v63 = vpop.f32.mrb[13].mxu0  ;;  %1923 = vmatprep.subr.bf16.mxu1 %v2370_v17 }
 0x21d   : > { %v1026_v0 = vpop.f32.mrb[14].mxu0  ;;  %vm829_vm4 = vcmp.ge.s32.totalorder %v815_v15, 0  ;;  %vm833_vm5 = vcmp.lt.s32.totalorder %v815_v15, %v2942_v14  ;;  %vm837_vm0 = vcmp.lt.s32.totalorder %v815_v15, %v2952_v20 }
 0x21e   : > { %v1030_v1 = vmax.f32 %v1024_v62, 0.0  ;;  %v1027_v2 = vadd.f32 %v2884_v23, %v1026_v0  ;;  %v1910_v3 = vpop.f32.mrb[15].mxu0  ;;  %vm841_vm12 = vmand %vm829_vm4, %vm833_vm5 }
 0x21f   : > { %1924 = vmatpush3.bf16.msra.mxu1 %v2872_v21  ;;  %vm845_vm5 = vmand %vm829_vm4, %vm837_vm0 }
 0x220   : > { %v1031_v4 = vmax.f32 %v1027_v2, 0.0  ;;  %1925 = vmatprep.subr.bf16.mxu1 %v2370_v17  ;;  %v816_v17 = vadd.s32 %v814_v10, %v811_v12 }
 0x222   : > { %v1032_v5 = vpack.c.bf16 %v1031_v4, %v1030_v1  ;;  %vm830_vm10 = vcmp.ge.s32.totalorder %v816_v17, 0  ;;  %vm834_vm11 = vcmp.lt.s32.totalorder %v816_v17, %v2942_v14  ;;  %vm838_vm2 = vcmp.lt.s32.totalorder %v816_v17, %v2952_v20 }
 0x223   : > { %1926 = vmatpush3.bf16.msra.mxu1 %v2876_v22  ;;  %vm842_vm14 = vmand %vm830_vm10, %vm834_vm11 }
 0x224   : > { %vm846_vm4 = vmand %vm830_vm10, %vm838_vm2  ;;  %vm971_vm10 = vcmp.lt.s32.totalorder %v968_v44, %v2952_v20 }
 0x225   : > { %vm3049_vm11 = vmand %vm969_vm6, %vm971_vm10 }
 0x226   : > { %1928 = vmatmul.mubr.bf16.vlgmr.msra.gmra.mrb[12].mxu1 %v1032_v5 }
 0x2b9   : > { %v1845_v19 = vpop.f32.mrb[0].mxu1 }
 0x2ba   : > { %v2954_v21 = vsel %vm843_vm9, %v1845_v19, 0.0  ;;  %v778_v22 = vpop.f32.mrb[1].mxu1  ;;  %vm972_vm9 = vmand %vm969_vm6, %vm970_vm8 }
 0x2bb   : > { %1091 = vst [vmem:[#allocation2 + $0x18] sm:$0xff] %v2954_v21  ;;  %v2958_v23 = vsel %vm841_vm12, %v778_v22, 0.0  ;;  %v1846_v24 = vpop.f32.mrb[2].mxu1 }
 0x2bc   : > { %1089 = vst [vmem:[#allocation2 + $0x8] sm:$0xff] %v2958_v23  ;;  %v2961_v25 = vsel %vm844_vm13, %v1846_v24, 0.0  ;;  %v781_v26 = vpop.f32.mrb[3].mxu1  ;;  %v3061_v24 = vld [vmem:[%s3404_s7 + $0x6] ss:$0 sm:$0xff]  ;;  %v1105_v35 = vmul.f32 %v2992_v41, %v2958_v23 }
 0x2bd   : > { %1092 = vst [vmem:[#allocation2 + $0x20] sm:$0xff] %v2961_v25  ;;  %v866_v27 = vsel %vm842_vm14, %v781_v26, 0.0  ;;  %v1107_v26 = vmul.f32 %v2992_v41, %v2954_v21 }
 0x2be   : > { %1090 = vst [vmem:[#allocation2 + $0x10] sm:$0xff] %v866_v27  ;;  %v1106_v43 = vmul.f32 %v2992_v41, %v866_v27  ;;  %v1108_v27 = vmul.f32 %v2992_v41, %v2961_v25 }
 0x2c1   : > { %v1849_v28 = vpop.f32.mrb[4].mxu1 }
 0x2c2   : > { %v2970_v29 = vsel %vm847_vm3, %v1849_v28, 0.0  ;;  %v794_v30 = vpop.f32.mrb[5].mxu1 }
 0x2c3   : > { %1095 = vst [vmem:[#allocation2 + $0x48] sm:$0xff] %v2970_v29  ;;  %v2973_v31 = vsel %vm845_vm5, %v794_v30, 0.0  ;;  %v1850_v32 = vpop.f32.mrb[6].mxu1 }
 0x2c4   : > { %1093 = vst [vmem:[#allocation2 + $0x38] sm:$0xff] %v2973_v31  ;;  %v2976_v33 = vsel %vm848_vm7, %v1850_v32, 0.0  ;;  %v797_v34 = vpop.f32.mrb[7].mxu1  ;;  %v3037_v5 = vld [vmem:[#allocation2 + $0x1b] sm:$0xff] }
 0x2c5   : > { %1096 = vst [vmem:[#allocation2 + $0x50] sm:$0xff] %v2976_v33  ;;  %v2989_v39 = vld [vmem:[#allocation2 + $0xb] sm:$0xff]  ;;  %v870_v48 = vsel %vm846_vm4, %v797_v34, 0.0  ;;  %v3044_v9 = vld [vmem:[#allocation2 + $0x13] sm:$0xff]  ;;  %v1129_v15 = vmul.f32 %v2987_v38, %v3037_v5  ;;  %v3072_v36 = vld [vmem:[#allocation2 + $0x1c] sm:$0xff] }
 0x2c6   : > { %v1127_v42 = vmul.f32 %v2987_v38, %v2989_v39  ;;  %v3004_v46 = vld [vmem:[#allocation2 + $0xc] sm:$0xff]  ;;  %1094 = vst [vmem:[#allocation2 + $0x40] sm:$0xff] %v870_v48  ;;  %v1110_v58 = vmul.f32 %v2992_v41, %v870_v48  ;;  %v1128_v19 = vmul.f32 %v2987_v38, %v3044_v9  ;;  %v3074_v37 = vld [vmem:[#allocation2 + $0x14] sm:$0xff] }
 0x2c7   : > { %v1156_v49 = vmul.f32 %v3002_v45, %v3004_v46  ;;  %v3014_v51 = vld [vmem:[#allocation2 + $0xd] sm:$0xff] }
 0x2c8   : > { %v1135_v47 = vadd.f32 %v1127_v42, %v1106_v43  ;;  %v1185_v53 = vmul.f32 %v3012_v50, %v3014_v51  ;;  %v1201_v55 = vld [vmem:[#allocation2 + $0xe] sm:$0xff]  ;;  %v1137_v43 = vadd.f32 %v1129_v15, %v1108_v27 }
 0x2c9   : > { %v1214_v0 = vmul.f32 %v3022_v54, %v1201_v55  ;;  %v1230_v8 = vld [vmem:[#allocation2 + $0xf] sm:$0xff]  ;;  %v1111_v55 = vmul.f32 %v2992_v41, %v2970_v29 }
 0x2ca   : > { %v1164_v52 = vadd.f32 %v1156_v49, %v1135_v47  ;;  %v1243_v16 = vmul.f32 %v3042_v6, %v1230_v8  ;;  %v1259_v22 = vld [vmem:[#allocation2 + $0x11] sm:$0xff]  ;;  %v1074_v49 = vstv %s980_s20  ;;  %v1258_v27 = vld [vmem:[#allocation2 + $0x9] sm:$0xff] }
 0x2cb   : > { %v1272_v44 = vmul.f32 %v3061_v24, %v1259_v22  ;;  %v1288_v23 = vld [vmem:[#allocation2 + $0x12] sm:$0xff] }
 0x2cc   : > { %v1193_v57 = vadd.f32 %v1185_v53, %v1164_v52  ;;  %v1136_v52 = vadd.f32 %v1128_v19, %v1107_v26  ;;  %v3084_v53 = vld [vmem:[%s3404_s7 + $0x7] ss:$0 sm:$0xff] }
 0x2cd   : > { %v3025_v61 = vld [vmem:[#allocation2 + $0x3b] sm:$0xff]  ;;  %v3076_v40 = vld [vmem:[#allocation2 + $0x43] sm:$0xff]  ;;  %v1301_v15 = vmul.f32 %v3084_v53, %v1288_v23 }
 0x2ce   : > { %v3027_v62 = vld [vmem:[#allocation2 + $0x3c] sm:$0xff]  ;;  %v1131_v1 = vmul.f32 %v2987_v38, %v3025_v61  ;;  %v1222_v10 = vadd.f32 %v1214_v0, %v1193_v57  ;;  %v1132_v0 = vmul.f32 %v2987_v38, %v3076_v40 }
 0x2cf   : > { %v1160_v2 = vmul.f32 %v3002_v45, %v3027_v62  ;;  %v3034_v3 = vld [vmem:[#allocation2 + $0x3d] sm:$0xff] }
 0x2d0   : > { %v1139_v11 = vadd.f32 %v1131_v1, %v1110_v58  ;;  %v1189_v12 = vmul.f32 %v3012_v50, %v3034_v3  ;;  %v1205_v18 = vld [vmem:[#allocation2 + $0x3e] sm:$0xff]  ;;  %v1251_v28 = vadd.f32 %v1243_v16, %v1222_v10  ;;  %v1158_v58 = vmul.f32 %v3002_v45, %v3072_v36  ;;  %v1202_v26 = vld [vmem:[#allocation2 + $0x16] sm:$0xff] }
 0x2d1   : > { %v1218_v21 = vmul.f32 %v3022_v54, %v1205_v18  ;;  %v1234_v47 = vld [vmem:[#allocation2 + $0x3f] sm:$0xff]  ;;  %v1109_v16 = vmul.f32 %v2992_v41, %v2973_v31  ;;  %v3112_v18 = vadd.s32 %v1074_v49, %v2933_v7  ;;  %v1215_v49 = vmul.f32 %v3022_v54, %v1202_v26 }
 0x2d2   : > { %v1168_v17 = vadd.f32 %v1160_v2, %v1139_v11  ;;  %v3097_v2 = vld [vmem:[#allocation2 + $0x44] sm:$0xff]  ;;  %v1247_v29 = vmul.f32 %v3042_v6, %v1234_v47 }
 0x2d3   : > { %v1263_v8 = vld [vmem:[#allocation2 + $0x41] sm:$0xff]  ;;  %vm1076_vm12 = vcmp.ge.s32.totalorder %v3112_v18, 0  ;;  %vm1077_vm13 = vcmp.lt.s32.totalorder %v3112_v18, %v2942_v14  ;;  %vm1078_vm14 = vcmp.lt.s32.totalorder %v3112_v18, %v2952_v20 }
 0x2d4   : > { %v1197_v42 = vadd.f32 %v1189_v12, %v1168_v17  ;;  %v3101_v12 = vadd.f32 %v1158_v58, %v1137_v43  ;;  %v1276_v31 = vmul.f32 %v3061_v24, %v1263_v8  ;;  %v1323_v58 = vmul.f32 %v3106_v13, %v2989_v39  ;;  %v3149_v39 = vld [vmem:[%s3404_s7 + $0xa] ss:$0 sm:$0xff]  ;;  %vm3187_vm15 = vmand %vm1076_vm12, %vm1077_vm13 }
 0x2d5   : > { %vm3204_vm0 = vmand %vm1076_vm12, %vm1078_vm14 }
 0x2d9   : > { %v960_v56 = vpop.f32.mrb[8].mxu1 }
 0x2da   : > { %v978_v59 = vsel %vm972_vm9, %v960_v56, 0.0  ;;  %v1889_v60 = vpop.f32.mrb[9].mxu1 }
 0x2db   : > { %1087 = vst [vmem:[#allocation2] sm:$0xff] %v978_v59  ;;  %v963_v63 = vpop.f32.mrb[10].mxu1  ;;  %v1157_v59 = vmul.f32 %v3002_v45, %v3074_v37  ;;  %v3093_v60 = vld [vmem:[#allocation2 + $0x15] sm:$0xff] }
 0x2dc   : > { %v1890_v4 = vpop.f32.mrb[11].mxu1  ;;  %v979_v34 = vsel %vm3049_vm11, %v963_v63, 0.0  ;;  %v1280_v63 = vadd.f32 %v1272_v44, %v1251_v28  ;;  %v1186_v22 = vmul.f32 %v3012_v50, %v3093_v60  ;;  %v1287_v28 = vld [vmem:[#allocation2 + $0xa] sm:$0xff] }
 0x2dd   : > { %1088 = vst [vmem:[#allocation2 + $0x30] sm:$0xff] %v979_v34  ;;  %v1226_v4 = vadd.f32 %v1218_v21, %v1197_v42  ;;  %v1165_v19 = vadd.f32 %v1157_v59, %v1136_v52  ;;  %v1161_v42 = vmul.f32 %v3002_v45, %v3097_v2  ;;  %v1271_v52 = vmul.f32 %v3061_v24, %v1258_v27  ;;  %v3139_v59 = vld [vmem:[#allocation2 + $0x4b] sm:$0xff] }
 0x2de   : > { %v1309_v34 = vadd.f32 %v1301_v15, %v1280_v63  ;;  %v1300_v23 = vmul.f32 %v3084_v53, %v1287_v28  ;;  %v1206_v15 = vld [vmem:[#allocation2 + $0x46] sm:$0xff]  ;;  %v1112_v28 = vmul.f32 %v2992_v41, %v2976_v33  ;;  %v1262_v33 = vld [vmem:[#allocation2 + $0x39] sm:$0xff] }
 0x2df   : > { %v1255_v43 = vadd.f32 %v1247_v29, %v1226_v4  ;;  %v1231_v41 = vld [vmem:[#allocation2 + $0x17] sm:$0xff] }
 0x2e2   : > { %v1113_v30 = vld [vmem:[#allocation2 + $0x3] sm:$0xff] }
 0x2e3   : > { %v1142_v32 = vld [vmem:[#allocation2 + $0x4] sm:$0xff]  ;;  %v1126_v25 = vmul.f32 %v2987_v38, %v1113_v30 }
 0x2e4   : > { %v1171_v48 = vld [vmem:[#allocation2 + $0x5] sm:$0xff]  ;;  %v1155_v57 = vmul.f32 %v3002_v45, %v1142_v32  ;;  %v1117_v21 = vld [vmem:[#allocation2 + $0x33] sm:$0xff] }
 0x2e5   : > { %v1134_v56 = vadd.f32 %v1126_v25, %v1105_v35  ;;  %v1200_v1 = vld [vmem:[#allocation2 + $0x6] sm:$0xff]  ;;  %v1184_v11 = vmul.f32 %v3012_v50, %v1171_v48  ;;  %v1140_v35 = vadd.f32 %v1132_v0, %v1111_v55  ;;  %v1146_v7 = vld [vmem:[#allocation2 + $0x34] sm:$0xff]  ;;  %v1130_v48 = vmul.f32 %v2987_v38, %v1117_v21 }
 0x2e6   : > { %v1229_v17 = vld [vmem:[#allocation2 + $0x7] sm:$0xff]  ;;  %v1213_v32 = vmul.f32 %v3022_v54, %v1200_v1  ;;  %v1324_v55 = vmul.f32 %v3106_v13, %v3044_v9  ;;  %v1159_v9 = vmul.f32 %v3002_v45, %v1146_v7  ;;  %v1194_v1 = vadd.f32 %v1186_v22, %v1165_v19 }
 0x2e7   : > { %v1163_v10 = vadd.f32 %v1155_v57, %v1134_v56  ;;  %v3120_v25 = vld [vmem:[#allocation2 + $0x45] sm:$0xff]  ;;  %v1242_v47 = vmul.f32 %v3042_v6, %v1229_v17  ;;  %v1175_v56 = vld [vmem:[#allocation2 + $0x35] sm:$0xff]  ;;  %v1138_v0 = vadd.f32 %v1130_v48, %v1109_v16  ;;  %v1169_v29 = vadd.f32 %v1161_v42, %v1140_v35 }
 0x2e8   : > { %v3135_v57 = vld [vmem:[%s3404_s7 + $0x9] ss:$0 sm:$0xff]  ;;  %v1332_v4 = vadd.f32 %v1324_v55, %v1309_v34  ;;  %v1190_v8 = vmul.f32 %v3012_v50, %v3120_v25  ;;  %v1284_v16 = vadd.f32 %v1276_v31, %v1255_v43  ;;  %v1188_v19 = vmul.f32 %v3012_v50, %v1175_v56  ;;  %v3160_v34 = vld [vmem:[#allocation2 + $0x4c] sm:$0xff] }
 0x2e9   : > { %v1192_v30 = vadd.f32 %v1184_v11, %v1163_v10  ;;  %v1292_v10 = vld [vmem:[#allocation2 + $0x42] sm:$0xff]  ;;  %v1204_v11 = vld [vmem:[#allocation2 + $0x36] sm:$0xff]  ;;  %v1167_v26 = vadd.f32 %v1159_v9, %v1138_v0  ;;  %v1346_v22 = vmul.f32 %v3135_v57, %v3004_v46  ;;  %v1347_v27 = vmul.f32 %v3135_v57, %v3074_v37  ;;  %v3174_v9 = vld [vmem:[#allocation2 + $0x4d] sm:$0xff] }
 0x2ea   : > { %v1305_v35 = vmul.f32 %v3084_v53, %v1292_v10  ;;  %v1217_v21 = vmul.f32 %v3022_v54, %v1204_v11  ;;  %v1369_v46 = vmul.f32 %v3149_v39, %v3014_v51  ;;  %v1198_v37 = vadd.f32 %v1190_v8, %v1169_v29  ;;  %v1291_v51 = vld [vmem:[#allocation2 + $0x3a] sm:$0xff] }
 0x2eb   : > { %v1221_v44 = vadd.f32 %v1213_v32, %v1192_v30  ;;  %v1133_v30 = vmul.f32 %v2987_v38, %v3139_v59  ;;  %v1233_v32 = vld [vmem:[#allocation2 + $0x37] sm:$0xff]  ;;  %v1196_v31 = vadd.f32 %v1188_v19, %v1167_v26  ;;  %v1355_v7 = vadd.f32 %v1347_v27, %v1332_v4 }
 0x2ec   : > { %v1219_v43 = vmul.f32 %v3022_v54, %v1206_v15  ;;  %v1313_v38 = vadd.f32 %v1305_v35, %v1284_v16  ;;  %v1223_v55 = vadd.f32 %v1215_v49, %v1194_v1  ;;  %v3172_v0 = vld [vmem:[#allocation2 + $0x1d] sm:$0xff]  ;;  %v1275_v4 = vmul.f32 %v3061_v24, %v1262_v33 }
 0x2ed   : > { %v1250_v63 = vadd.f32 %v1242_v47, %v1221_v44  ;;  %v1235_v44 = vld [vmem:[#allocation2 + $0x47] sm:$0xff]  ;;  %v1225_v48 = vadd.f32 %v1217_v21, %v1196_v31  ;;  %v1141_v56 = vadd.f32 %v1133_v30, %v1112_v28  ;;  %v1244_v49 = vmul.f32 %v3042_v6, %v1231_v41  ;;  %v1260_v11 = vld [vmem:[#allocation2 + $0x19] sm:$0xff] }
 0x2ee   : > { %v1248_v10 = vmul.f32 %v3042_v6, %v1235_v44  ;;  %v1304_v15 = vmul.f32 %v3084_v53, %v1291_v51  ;;  %v1187_v19 = vmul.f32 %v3012_v50, %v3172_v0  ;;  %v1191_v28 = vmul.f32 %v3012_v50, %v3174_v9  ;;  %v1203_v30 = vld [vmem:[#allocation2 + $0x1e] sm:$0xff] }
 0x2ef   : > { %v1279_v17 = vadd.f32 %v1271_v52, %v1250_v63  ;;  %v1246_v52 = vmul.f32 %v3042_v6, %v1233_v32  ;;  %v1162_v63 = vmul.f32 %v3002_v45, %v3160_v34  ;;  %v1264_v45 = vld [vmem:[#allocation2 + $0x49] sm:$0xff]  ;;  %v1327_v35 = vmul.f32 %v3106_v13, %v3025_v61  ;;  %v1289_v33 = vld [vmem:[#allocation2 + $0x1a] sm:$0xff] }
 0x2f0   : > { %v1207_v32 = vld [vmem:[#allocation2 + $0x4e] sm:$0xff]  ;;  %v1351_v14 = vmul.f32 %v3135_v57, %v3097_v2  ;;  %v1273_v50 = vmul.f32 %v3061_v24, %v1260_v11  ;;  %v1277_v61 = vmul.f32 %v3061_v24, %v1264_v45  ;;  %v1350_v20 = vmul.f32 %v3135_v57, %v3027_v62  ;;  %v1232_v51 = vld [vmem:[#allocation2 + $0x1f] sm:$0xff] }
 0x2f1   : > { %v1308_v42 = vadd.f32 %v1300_v23, %v1279_v17  ;;  %v1370_v23 = vmul.f32 %v3149_v39, %v3093_v60  ;;  %v1254_v8 = vadd.f32 %v1246_v52, %v1225_v48  ;;  %v1227_v60 = vadd.f32 %v1219_v43, %v1198_v37  ;;  %v1293_v62 = vld [vmem:[#allocation2 + $0x4a] sm:$0xff] }
 0x2f2   : > { %v1170_v27 = vadd.f32 %v1162_v63, %v1141_v56  ;;  %v1195_v43 = vadd.f32 %v1187_v19, %v3101_v12  ;;  %v1220_v48 = vmul.f32 %v3022_v54, %v1207_v32  ;;  %v1374_v56 = vmul.f32 %v3149_v39, %v3120_v25 }
 0x2f3   : > { %v1331_v47 = vadd.f32 %v1323_v58, %v1308_v42  ;;  %v1328_v58 = vmul.f32 %v3106_v13, %v3076_v40  ;;  %v1378_v1 = vadd.f32 %v1370_v23, %v1355_v7  ;;  %v1283_v26 = vadd.f32 %v1275_v4, %v1254_v8 }
 0x2f4   : > { %v1373_v23 = vmul.f32 %v3149_v39, %v3034_v3  ;;  %v1302_v4 = vmul.f32 %v3084_v53, %v1289_v33  ;;  %v1325_v45 = vmul.f32 %v3106_v13, %v3037_v5 }
 0x2f5   : > { %v1354_v29 = vadd.f32 %v1346_v22, %v1331_v47  ;;  %v1336_v16 = vadd.f32 %v1328_v58, %v1313_v38  ;;  %v1252_v22 = vadd.f32 %v1244_v49, %v1223_v55  ;;  %v1312_v31 = vadd.f32 %v1304_v15, %v1283_v26  ;;  %v1236_v58 = vld [vmem:[#allocation2 + $0x4f] sm:$0xff] }
 0x2f6   : > { %v1216_v38 = vmul.f32 %v3022_v54, %v1203_v30  ;;  %v1199_v55 = vadd.f32 %v1191_v28, %v1170_v27  ;;  %v1249_v11 = vmul.f32 %v3042_v6, %v1236_v58 }
 0x2f7   : > { %v1377_v17 = vadd.f32 %v1369_v46, %v1354_v29  ;;  %v1256_v46 = vadd.f32 %v1248_v10, %v1227_v60  ;;  %v1359_v18 = vadd.f32 %v1351_v14, %v1336_v16  ;;  %v1335_v41 = vadd.f32 %v1327_v35, %v1312_v31 }
 0x2f8   : > { %v1281_v47 = vadd.f32 %v1273_v50, %v1252_v22  ;;  %v1224_v54 = vadd.f32 %v1216_v38, %v1195_v43  ;;  %v1306_v60 = vmul.f32 %v3084_v53, %v1293_v62  ;;  %v1245_v10 = vmul.f32 %v3042_v6, %v1232_v51 }
 0x2f9   : > { %v1723_v42 = vpack.c.bf16 %v1378_v1, %v1377_v17  ;;  %v1067_v21 = vpop.f32.mrb[12].mxu1  ;;  %v1358_v63 = vadd.f32 %v1350_v20, %v1335_v41  ;;  %v1285_v29 = vadd.f32 %v1277_v61, %v1256_v46  ;;  %v1382_v8 = vadd.f32 %v1374_v56, %v1359_v18 }
 0x2fa   : > { %v1085_v2 = vsel %vm3187_vm15, %v1067_v21, 0.0  ;;  %v1929_v37 = vpop.f32.mrb[13].mxu1  ;;  %v1310_v1 = vadd.f32 %v1302_v4, %v1281_v47  ;;  %v1228_v3 = vadd.f32 %v1220_v48, %v1199_v55  ;;  %v1253_v26 = vadd.f32 %v1245_v10, %v1224_v54 }
 0x2fb   : > { %1097 = vst [vmem:[#allocation2 + $0x28] sm:$0xff] %v1085_v2  ;;  %1724 = vst [vmem:[%s3217_s28] sm:$0xff] %v1723_v42   ;;  %v1070_v44 = vpop.f32.mrb[14].mxu1  ;;  %v1381_v49 = vadd.f32 %v1373_v23, %v1358_v63  ;;  %v1314_v15 = vadd.f32 %v1306_v60, %v1285_v29  ;;  %v1329_v22 = vmul.f32 %v3106_v13, %v3139_v59 }
 0x2fc   : > { %v1086_v12 = vsel %vm3204_vm0, %v1070_v44, 0.0  ;;  %v1930_v52 = vpop.f32.mrb[15].mxu1  ;;  %v1333_v19 = vadd.f32 %v1325_v45, %v1310_v1  ;;  %v1257_v32 = vadd.f32 %v1249_v11, %v1228_v3  ;;  %v1348_v14 = vmul.f32 %v3135_v57, %v3072_v36 }
 0x2fd   : > { %1098 = vst [vmem:[#allocation2 + $0x58] sm:$0xff] %v1086_v12  ;;  %v1733_v25 = vpack.c.bf16 %v1382_v8, %v1381_v49  ;;  %v1337_v42 = vadd.f32 %v1329_v22, %v1314_v15  ;;  %v1352_v2 = vmul.f32 %v3135_v57, %v3160_v34  ;;  %v1371_v18 = vmul.f32 %v3149_v39, %v3172_v0 }
 0x2fe   : > { %v1356_v46 = vadd.f32 %v1348_v14, %v1333_v19  ;;  %v1375_v48 = vmul.f32 %v3149_v39, %v3174_v9 }
 0x2ff   : > { %1741 = vst [vmem:[%s3217_s28 + $0x10] sm:$0xff] %v1733_v25   ;;  %v1360_v41 = vadd.f32 %v1352_v2, %v1337_v42 }
 0x300   : > { %v1379_v12 = vadd.f32 %v1371_v18, %v1356_v46 }
 0x301   : > { %v1383_v0 = vadd.f32 %v1375_v48, %v1360_v41 }
 0x302   : > { %v1261_v16 = vld [vmem:[#allocation2 + $0x21] sm:$0xff] }
 0x303   : > { %v1290_v17 = vld [vmem:[#allocation2 + $0x22] sm:$0xff]  ;;  %v1274_v40 = vmul.f32 %v3061_v24, %v1261_v16 }
 0x304   : > { %v1316_v27 = vld [vmem:[#allocation2 + $0x23] sm:$0xff]  ;;  %v1265_v28 = vld [vmem:[#allocation2 + $0x51] sm:$0xff]  ;;  %v1303_v35 = vmul.f32 %v3084_v53, %v1290_v17 }
 0x305   : > { %v1294_v30 = vld [vmem:[#allocation2 + $0x52] sm:$0xff]  ;;  %v1282_v6 = vadd.f32 %v1274_v40, %v1253_v26  ;;  %v1278_v5 = vmul.f32 %v3061_v24, %v1265_v28  ;;  %v1339_v31 = vld [vmem:[#allocation2 + $0x24] sm:$0xff]  ;;  %v1326_v50 = vmul.f32 %v3106_v13, %v1316_v27 }
 0x306   : > { %v1317_v21 = vld [vmem:[#allocation2 + $0x53] sm:$0xff]  ;;  %v1307_v59 = vmul.f32 %v3084_v53, %v1294_v30  ;;  %v1362_v37 = vld [vmem:[#allocation2 + $0x25] sm:$0xff]  ;;  %v1349_v24 = vmul.f32 %v3135_v57, %v1339_v31 }
 0x307   : > { %v1311_v7 = vadd.f32 %v1303_v35, %v1282_v6  ;;  %v1286_v61 = vadd.f32 %v1278_v5, %v1257_v32  ;;  %v1340_v43 = vld [vmem:[#allocation2 + $0x54] sm:$0xff]  ;;  %v1330_v36 = vmul.f32 %v3106_v13, %v1317_v21  ;;  %v1372_v38 = vmul.f32 %v3149_v39, %v1362_v37 }
 0x308   : > { %v1363_v44 = vld [vmem:[#allocation2 + $0x55] sm:$0xff]  ;;  %v1353_v47 = vmul.f32 %v3135_v57, %v1340_v43 }
 0x309   : > { %v1334_v33 = vadd.f32 %v1326_v50, %v1311_v7  ;;  %v1315_v20 = vadd.f32 %v1307_v59, %v1286_v61  ;;  %v1376_v55 = vmul.f32 %v3149_v39, %v1363_v44 }
 0x30b   : > { %v1357_v53 = vadd.f32 %v1349_v24, %v1334_v33  ;;  %v1338_v34 = vadd.f32 %v1330_v36, %v1315_v20 }
 0x30d   : > { %v1380_v52 = vadd.f32 %v1372_v38, %v1357_v53  ;;  %v1361_v13 = vadd.f32 %v1353_v47, %v1338_v34 }
 0x30f   : > { %v1728_v62 = vpack.c.bf16 %v1380_v52, %v1379_v12  ;;  %v1384_v23 = vadd.f32 %v1376_v55, %v1361_v13 }
 0x311   : > { %1740 = vst [vmem:[%s3217_s28 + $0x8] sm:$0xff] %v1728_v62   ;;  %v1738_v56 = vpack.c.bf16 %v1384_v23, %v1383_v0 }
 0x313   : > { %1742 = vst [vmem:[%s3217_s28 + $0x18] sm:$0xff] %v1738_v56  }
 0x314   : > { %s3411_s29 = sld [smem:[#allocation37_spill]]  ;;  %s1719_s26 = sshll.u32 %s3403_s11, 8 }
 0x315   : > { %s1458_s30 = sshll.u32 %s3217_s28, 4  ;;  %s3412_s14 = sld [smem:[#allocation44_spill]]  ;;  %s1459_s30 = int_to_ptr.vmem [resolvable:$true] %s1458_s30 }
 0x316   : > { %s2372_s13 = smov 256   ;;  %s2373_s12 = smov 512  }
 0x317   : > { %s2374_s20 = smov 4   ;;  %s2375_s9 = smov 64  }
 0x318   : > { %s2376_s11 = smov [#allocation17]   ;;  %s2377_s4 = smov 0  }
 0x31a   : > { %p3413_p7 = scmp.ne.s32.totalorder %s3411_s29, 0 }
 0x31b   : > { %s1441_s18 = scalar_lea.hbm %s3412_s14, %s1719_s26 }
 0x31c   : > { %1952 = sst [smem:[#allocation18]] (%p3413_p7), %s2372_s13 }
 0x31d   : > { %1953 = sst [smem:[#allocation18 + $0x1]] (%p3413_p7), %s2373_s12 }
 0x31e   : > { %1954 = sst [smem:[#allocation18 + $0x2]] (%p3413_p7), %s2374_s20 }
 0x31f   : > { %1955 = sst [smem:[#allocation18 + $0x3]] (%p3413_p7), %s2375_s9 }
 0x320   : > { %1956 = sst [smem:[#allocation18 + $0x4]] (%p3413_p7), %s2375_s9 }
 0x321   : > { %1957 = sst [smem:[#allocation18 + $0x5]] (%p3413_p7), %s2374_s20 }
 0x322   : > { %1958 = dma.general (%p3413_p7), %s1459_s30, 512, %s1441_s18, %s1426_s27, %s2376_s11, [#allocation18], %s2377_s4, 0  }
 0x323 PF: > { %s3414_s16 = sld [smem:[#allocation28_spill]]  ;;  %s3415_s5 = sld [smem:[#allocation39_spill]] }
 0x329   : > { %s1486_s8 = sand.u32 1, %s3414_s16   ;;  %p3416_p9 = scmp.ne.s32.totalorder %s3415_s5, 0 }
 0x32a   : > { %s1487_s10 = scalar_lea.sflag [#allocation7], %s1486_s8 }
 0x32b   : > { %p1968_p12 = pnand %p1635_p8, %p3416_p9 }
 0x32d   : > { %2304 = dma.done.wait (!%p1968_p12), %s1487_s10, 512  }
 0x32e   : > { %2306 = vsyncadd (!%p1968_p12), %s1487_s10, 4294966784  ;;  %s32_s25 = sadd.s32 1, %s2353_s25   ;;  %s3417_s15 = sld [smem:[#allocation26_spill]] }
 0x32f   : > { %p29_p1 = scmp.ge.s32.totalorder %s32_s25, 4   ;;  %s3418_s1 = sld [smem:[#allocation38_spill]] }
 0x330   : > { %s3419_s18 = sld [smem:[#allocation27_spill]]  ;;  %s3420_s28 = sld [smem:[#allocation35_spill]] }
 0x331   : > { %s3421_s27 = sld [smem:[#allocation33_spill]]  ;;  %s3422_s29 = sld [smem:[#allocation31_spill]] }
 0x332   : > { %s3423_s16 = smov %s2317_s17  ;;  %s3425_s19 = smov %s2329_s0 }
 0x333   : > { %s3427_s20 = smov %s2337_s21  ;;  %s3428_s21 = smov %s2341_s22 }
 0x334   : > { %s3430_s23 = smov %s2349_s24  ;;  %31 = sbr.rel (!%p29_p1) target bundleno = 25 (0x19), region = 135 }
 0x335   : > { %s3424_s17 = smov %s3418_s1 }
 0x336   : > { %s3426_s0 = smov %s3420_s28 }
 0x337   : > { %s3429_s22 = smov %s3421_s27  ;;  %s3431_s24 = smov %s3422_s29 }
 0x33b   :  { %1492 = vsyncpa [#allocation6], 1 }
 0x33c   :  { %1494 = vsyncpa [#allocation6 + $0x1], 1 }
 0x33d   :  { %1495 = vsyncpa [#allocation9], 1 }
 0x33e   :  { %1497 = vsyncpa [#allocation9 + $0x1], 1 }
 0x33f   :  { %1498 = vsyncpa [#allocation12], 1 }
 0x340   :  { %1499 = vsyncpa [#allocation7], 1 }
 0x341   :  { %1501 = vsyncpa [#allocation7 + $0x1], 1 }

</bundles_post_ra>
